<compile_context>
chip_gen: v6e
topology: v6e:2x2x1
jax: 0.10.0
libtpu: 0.0.40
codegen_flags: <defaults>
</compile_context>

<pallas_src>
import functools

import jax
import jax.numpy as jnp
from jax.experimental import pallas as pl
from jax.experimental.pallas import tpu as pltpu


def nif_kernel(x1_ref, x2_ref, wsse_ref, bsse_ref, wca_ref, wcb_ref, bcat_ref,
               wse1_ref, bse1_ref, wse2_ref, bse2_ref, o_ref, *, H, W):
    # x1_ref: (1, 4*H*W, C//2)    x2_ref / o_ref: (1, H*W, C)
    HW = H * W
    _, _, C = x2_ref.shape
    x1f = x1_ref[0]                                   # (4HW, C//2)
    x2f = x2_ref[0]                                   # (HW, C)

    # ---- sSE: 1x1 conv (C//2 -> C) + ReLU at full resolution -----------------
    s = jnp.maximum(
        jnp.dot(x1f, wsse_ref[...], preferred_element_type=jnp.float32)
        + bsse_ref[...], 0.0)                         # (4HW, C), rows = (i, j)

    # ---- MaxPool2d(2, stride=2) ----------------------------------------------
    # Only leading-dim-splitting reshapes (minor dim C preserved), static
    # slices and elementwise max -> no cross-lane relayouts / strided slices.
    s4 = s.reshape(2 * HW, 2, C)                      # pair = adjacent columns
    pw = jnp.maximum(s4[:, 0, :], s4[:, 1, :])        # (2H*W, C): pooled over W
    p4 = pw.reshape(H, 2, W, C)                       # pair = adjacent rows
    pooled = jnp.maximum(p4[:, 0], p4[:, 1])          # (H, W, C): pooled over H
    pooled = pooled.reshape(HW, C)                    # (HW, C)

    # ---- fusion conv on cat([sSE(x1), x2]): weight pre-split, no concat -------
    y = jnp.maximum(
        jnp.dot(pooled, wca_ref[...], preferred_element_type=jnp.float32)
        + jnp.dot(x2f, wcb_ref[...], preferred_element_type=jnp.float32)
        + bcat_ref[...], 0.0)                         # (HW, C)

    # ---- cSE: global avg pool as an MXU matvec + tiny MLP + sigmoid gate ------
    ones_row = jnp.full((1, HW), 1.0, jnp.float32)
    avg = jnp.dot(ones_row, y, preferred_element_type=jnp.float32) * (1.0 / HW)
    h = jnp.maximum(
        jnp.dot(avg, wse1_ref[...], preferred_element_type=jnp.float32)
        + bse1_ref[...], 0.0)                         # (1, Cr)
    g = jax.nn.sigmoid(
        jnp.dot(h, wse2_ref[...], preferred_element_type=jnp.float32)
        + bse2_ref[...])                              # (1, C)

    # ---- gate + residual ------------------------------------------------------
    o_ref[0] = y * g + x2f


def nif_forward(x1_nchw, x2_nchw, params):
    """x1: (N, C//2, 2H, 2W), x2: (N, C, H, W)  ->  (N, C, H, W), float32."""
    x1 = jnp.transpose(x1_nchw, (0, 2, 3, 1)).astype(jnp.float32)   # (N, 2H, 2W, C//2)
    x2 = jnp.transpose(x2_nchw, (0, 2, 3, 1)).astype(jnp.float32)   # (N, H, W, C)
    N, H2, W2, Ch = x1.shape
    _, H, W, C = x2.shape
    assert H2 == 2 * H and W2 == 2 * W and Ch * 2 == C
    Cr = params["w_se1"].shape[1]
    HW = H * W

    x1_flat = x1.reshape(N, 4 * HW, Ch)       # contiguous row-major, metadata only
    x2_flat = x2.reshape(N, HW, C)

    # Pre-split the fusion-conv weight so the kernel never slices / concats.
    wca = params["w_cat"][:C]                 # applied to the sSE branch
    wcb = params["w_cat"][C:]                 # applied to x2

    def full(shape):
        return pl.BlockSpec(shape, lambda b: (0,) * len(shape))

    flops = N * (2 * 4 * HW * Ch * C          # sSE conv
                 + 2 * HW * 2 * C * C         # fusion conv (both halves)
                 + 2 * HW * C                 # global-avg matvec
                 + 4 * C * Cr                 # cSE MLP
                 + 6 * HW * C)                # pooling max + gate + residual
    bytes_accessed = 4 * (x1_flat.size + x2_flat.size + N * HW * C
                          + params["w_sse"].size + params["w_cat"].size
                          + params["w_se1"].size + params["w_se2"].size
                          + 3 * C + Cr)

    out = pl.pallas_call(
        functools.partial(nif_kernel, H=H, W=W),
        out_shape=jax.ShapeDtypeStruct((N, HW, C), jnp.float32),
        grid=(N,),
        in_specs=[
            pl.BlockSpec((1, 4 * HW, Ch), lambda b: (b, 0, 0)),   # x1
            pl.BlockSpec((1, HW, C), lambda b: (b, 0, 0)),        # x2
            full((Ch, C)),                                        # sSE conv w
            full((1, C)),                                         # sSE conv b
            full((C, C)),                                         # fusion w (sSE half)
            full((C, C)),                                         # fusion w (x2 half)
            full((1, C)),                                         # fusion b
            full((C, Cr)),                                        # cSE fc1 w
            full((1, Cr)),                                        # cSE fc1 b
            full((Cr, C)),                                        # cSE fc2 w
            full((1, C)),                                         # cSE fc2 b
        ],
        out_specs=pl.BlockSpec((1, HW, C), lambda b: (b, 0, 0)),
        compiler_params=pltpu.CompilerParams(
            dimension_semantics=("parallel",),        # N=2 -> both TCs on v7x
            vmem_limit_bytes=32 * 1024 * 1024),
        cost_estimate=pl.CostEstimate(
            flops=int(flops), transcendentals=int(N * C),
            bytes_accessed=int(bytes_accessed)),
    )(x1_flat, x2_flat,
      params["w_sse"], params["b_sse"].reshape(1, C),
      wca, wcb, params["b_cat"].reshape(1, C),
      params["w_se1"], params["b_se1"].reshape(1, Cr),
      params["w_se2"], params["b_se2"].reshape(1, C))

    out = out.reshape(N, H, W, C)
    return jnp.transpose(out, (0, 3, 1, 2))           # back to NCHW


def nif_reference(x1_nchw, x2_nchw, params):
    """Pure-JAX reference (same math, different code path), NCHW in/out."""
    x1 = jnp.transpose(x1_nchw, (0, 2, 3, 1)).astype(jnp.float32)
    x2 = jnp.transpose(x2_nchw, (0, 2, 3, 1)).astype(jnp.float32)
    N, H2, W2, _ = x1.shape
    _, H, W, C = x2.shape

    s = jnp.maximum(jnp.einsum("nhwc,cd->nhwd", x1, params["w_sse"])
                    + params["b_sse"], 0.0)
    s = s.reshape(N, H, 2, W, 2, C).max(axis=(2, 4))          # MaxPool2d(2, 2)

    cat = jnp.concatenate([s, x2], axis=-1)
    y = jnp.maximum(jnp.einsum("nhwc,cd->nhwd", cat, params["w_cat"])
                    + params["b_cat"], 0.0)

    avg = y.mean(axis=(1, 2))                                  # (N, C)
    h = jnp.maximum(avg @ params["w_se1"] + params["b_se1"], 0.0)
    g = jax.nn.sigmoid(h @ params["w_se2"] + params["b_se2"])  # (N, C)

    out = y * g[:, None, None, :] + x2
    return jnp.transpose(out, (0, 3, 1, 2))


if __name__ == "__main__":
    N, C, H, W = 2, 32, 8, 8        # reduction=16 -> cSE hidden = 2; x1 has C//2 channels
    Ch, Cr = C // 2, C // 16

    key = jax.random.PRNGKey(0)
    ks = jax.random.split(key, 10)
    x1 = jax.random.normal(ks[0], (N, Ch, 2 * H, 2 * W), jnp.float32)  # pre-pool resolution
    x2 = jax.random.normal(ks[1], (N, C, H, W), jnp.float32)

    params = {
        "w_sse": 0.2 * jax.random.normal(ks[2], (Ch, C), jnp.float32),
        "b_sse": 0.1 * jax.random.normal(ks[3], (C,), jnp.float32),
        "w_cat": 0.1 * jax.random.normal(ks[4], (2 * C, C), jnp.float32),
        "b_cat": 0.1 * jax.random.normal(ks[5], (C,), jnp.float32),
        "w_se1": 0.2 * jax.random.normal(ks[6], (C, Cr), jnp.float32),
        "b_se1": 0.1 * jax.random.normal(ks[7], (Cr,), jnp.float32),
        "w_se2": 0.2 * jax.random.normal(ks[8], (Cr, C), jnp.float32),
        "b_se2": 0.1 * jax.random.normal(ks[9], (C,), jnp.float32),
    }

    out = jax.block_until_ready(nif_forward(x1, x2, params))
    ref = jax.block_until_ready(nif_reference(x1, x2, params))

    assert out.shape == (N, C, H, W), out.shape
    err = float(jnp.max(jnp.abs(out - ref)))
    assert jnp.allclose(out, ref, atol=1e-3, rtol=1e-3), err
    print("KERNEL_OK")
</pallas_src>

<mosaic_0001>
module attributes {stable_mosaic.version = 11 : i64} {
  func.func @nif_kernel(%arg0: i32, %arg1: memref<1x256x16xf32, #tpu.memory_space<vmem>>, %arg2: memref<1x64x32xf32, #tpu.memory_space<vmem>>, %arg3: memref<16x32xf32, #tpu.memory_space<vmem>>, %arg4: memref<1x32xf32, #tpu.memory_space<vmem>>, %arg5: memref<32x32xf32, #tpu.memory_space<vmem>>, %arg6: memref<32x32xf32, #tpu.memory_space<vmem>>, %arg7: memref<1x32xf32, #tpu.memory_space<vmem>>, %arg8: memref<32x2xf32, #tpu.memory_space<vmem>>, %arg9: memref<1x2xf32, #tpu.memory_space<vmem>>, %arg10: memref<2x32xf32, #tpu.memory_space<vmem>>, %arg11: memref<1x32xf32, #tpu.memory_space<vmem>>, %arg12: memref<1x64x32xf32, #tpu.memory_space<vmem>>) attributes {dimension_semantics = [#tpu.dimension_semantics<parallel>], iteration_bounds = array<i64: 2>, scalar_prefetch = 0 : i64, scratch_operands = 0 : i64, tpu.core_type = #tpu.core_type<tc>, window_params = [{transform_indices = @transform_0, window_bounds = array<i64: 1, 256, 16>}, {transform_indices = @transform_1, window_bounds = array<i64: 1, 64, 32>}, {pipeline_mode = #tpu.pipeline_mode<synchronous>, transform_indices = @transform_2, window_bounds = array<i64: 16, 32>}, {pipeline_mode = #tpu.pipeline_mode<synchronous>, transform_indices = @transform_3, window_bounds = array<i64: 1, 32>}, {pipeline_mode = #tpu.pipeline_mode<synchronous>, transform_indices = @transform_4, window_bounds = array<i64: 32, 32>}, {pipeline_mode = #tpu.pipeline_mode<synchronous>, transform_indices = @transform_5, window_bounds = array<i64: 32, 32>}, {pipeline_mode = #tpu.pipeline_mode<synchronous>, transform_indices = @transform_6, window_bounds = array<i64: 1, 32>}, {pipeline_mode = #tpu.pipeline_mode<synchronous>, transform_indices = @transform_7, window_bounds = array<i64: 32, 2>}, {pipeline_mode = #tpu.pipeline_mode<synchronous>, transform_indices = @transform_8, window_bounds = array<i64: 1, 2>}, {pipeline_mode = #tpu.pipeline_mode<synchronous>, transform_indices = @transform_9, window_bounds = array<i64: 2, 32>}, {pipeline_mode = #tpu.pipeline_mode<synchronous>, transform_indices = @transform_10, window_bounds = array<i64: 1, 32>}, {transform_indices = @transform_11, window_bounds = array<i64: 1, 64, 32>}]} {
    %c0 = arith.constant 0 : index
    %c0_0 = arith.constant 0 : index
    %c0_1 = arith.constant 0 : index
    %0 = vector.load %arg1[%c0, %c0_0, %c0_1] : memref<1x256x16xf32, #tpu.memory_space<vmem>>, vector<1x256x16xf32>
    %1 = vector.shape_cast %0 : vector<1x256x16xf32> to vector<256x16xf32>
    %c0_2 = arith.constant 0 : index
    %c0_3 = arith.constant 0 : index
    %c0_4 = arith.constant 0 : index
    %2 = vector.load %arg2[%c0_2, %c0_3, %c0_4] : memref<1x64x32xf32, #tpu.memory_space<vmem>>, vector<1x64x32xf32>
    %3 = vector.shape_cast %2 : vector<1x64x32xf32> to vector<64x32xf32>
    %c0_5 = arith.constant 0 : index
    %c0_6 = arith.constant 0 : index
    %4 = vector.load %arg3[%c0_5, %c0_6] : memref<16x32xf32, #tpu.memory_space<vmem>>, vector<16x32xf32>
    %cst = arith.constant dense<0.000000e+00> : vector<256x32xf32>
    %5 = tpu.matmul %1, %4, %cst {dimension_numbers = #tpu.dot_dimension_numbers<[1], [0], [0], [1], [0, 0, 1, 1], [], []>} : vector<256x16xf32>, vector<16x32xf32>, vector<256x32xf32> -> vector<256x32xf32>
    %c0_7 = arith.constant 0 : index
    %c0_8 = arith.constant 0 : index
    %6 = vector.load %arg4[%c0_7, %c0_8] : memref<1x32xf32, #tpu.memory_space<vmem>>, vector<1x32xf32>
    %7 = vector.broadcast %6 : vector<1x32xf32> to vector<256x32xf32>
    %8 = arith.addf %5, %7 : vector<256x32xf32>
    %cst_9 = arith.constant 0.000000e+00 : f32
    %9 = vector.broadcast %cst_9 : f32 to vector<256x32xf32>
    %10 = arith.maximumf %8, %9 : vector<256x32xf32>
    %11 = vector.shape_cast %10 : vector<256x32xf32> to vector<128x2x32xf32>
    %12 = vector.extract_strided_slice %11 {offsets = [0, 0, 0], sizes = [128, 1, 32], strides = [1, 1, 1]} : vector<128x2x32xf32> to vector<128x1x32xf32>
    %13 = vector.shape_cast %12 : vector<128x1x32xf32> to vector<128x32xf32>
    %14 = vector.extract_strided_slice %11 {offsets = [0, 1, 0], sizes = [128, 1, 32], strides = [1, 1, 1]} : vector<128x2x32xf32> to vector<128x1x32xf32>
    %15 = vector.shape_cast %14 : vector<128x1x32xf32> to vector<128x32xf32>
    %16 = arith.maximumf %13, %15 : vector<128x32xf32>
    %17 = vector.shape_cast %16 : vector<128x32xf32> to vector<8x2x8x32xf32>
    %18 = vector.extract_strided_slice %17 {offsets = [0, 0, 0, 0], sizes = [8, 1, 8, 32], strides = [1, 1, 1, 1]} : vector<8x2x8x32xf32> to vector<8x1x8x32xf32>
    %19 = vector.shape_cast %18 : vector<8x1x8x32xf32> to vector<8x8x32xf32>
    %20 = vector.extract_strided_slice %17 {offsets = [0, 1, 0, 0], sizes = [8, 1, 8, 32], strides = [1, 1, 1, 1]} : vector<8x2x8x32xf32> to vector<8x1x8x32xf32>
    %21 = vector.shape_cast %20 : vector<8x1x8x32xf32> to vector<8x8x32xf32>
    %22 = arith.maximumf %19, %21 : vector<8x8x32xf32>
    %23 = vector.shape_cast %22 : vector<8x8x32xf32> to vector<64x32xf32>
    %c0_10 = arith.constant 0 : index
    %c0_11 = arith.constant 0 : index
    %24 = vector.load %arg5[%c0_10, %c0_11] : memref<32x32xf32, #tpu.memory_space<vmem>>, vector<32x32xf32>
    %cst_12 = arith.constant dense<0.000000e+00> : vector<64x32xf32>
    %25 = tpu.matmul %23, %24, %cst_12 {dimension_numbers = #tpu.dot_dimension_numbers<[1], [0], [0], [1], [0, 0, 1, 1], [], []>} : vector<64x32xf32>, vector<32x32xf32>, vector<64x32xf32> -> vector<64x32xf32>
    %c0_13 = arith.constant 0 : index
    %c0_14 = arith.constant 0 : index
    %26 = vector.load %arg6[%c0_13, %c0_14] : memref<32x32xf32, #tpu.memory_space<vmem>>, vector<32x32xf32>
    %cst_15 = arith.constant dense<0.000000e+00> : vector<64x32xf32>
    %27 = tpu.matmul %3, %26, %cst_15 {dimension_numbers = #tpu.dot_dimension_numbers<[1], [0], [0], [1], [0, 0, 1, 1], [], []>} : vector<64x32xf32>, vector<32x32xf32>, vector<64x32xf32> -> vector<64x32xf32>
    %28 = arith.addf %25, %27 : vector<64x32xf32>
    %c0_16 = arith.constant 0 : index
    %c0_17 = arith.constant 0 : index
    %29 = vector.load %arg7[%c0_16, %c0_17] : memref<1x32xf32, #tpu.memory_space<vmem>>, vector<1x32xf32>
    %30 = vector.broadcast %29 : vector<1x32xf32> to vector<64x32xf32>
    %31 = arith.addf %28, %30 : vector<64x32xf32>
    %cst_18 = arith.constant 0.000000e+00 : f32
    %32 = vector.broadcast %cst_18 : f32 to vector<64x32xf32>
    %33 = arith.maximumf %31, %32 : vector<64x32xf32>
    %cst_19 = arith.constant 1.000000e+00 : f32
    %34 = vector.broadcast %cst_19 : f32 to vector<1x64xf32>
    %cst_20 = arith.constant dense<0.000000e+00> : vector<1x32xf32>
    %35 = tpu.matmul %34, %33, %cst_20 {dimension_numbers = #tpu.dot_dimension_numbers<[1], [0], [0], [1], [0, 0, 1, 1], [], []>} : vector<1x64xf32>, vector<64x32xf32>, vector<1x32xf32> -> vector<1x32xf32>
    %cst_21 = arith.constant 1.562500e-02 : f32
    %36 = vector.broadcast %cst_21 : f32 to vector<1x32xf32>
    %37 = arith.mulf %35, %36 : vector<1x32xf32>
    %c0_22 = arith.constant 0 : index
    %c0_23 = arith.constant 0 : index
    %38 = vector.load %arg8[%c0_22, %c0_23] : memref<32x2xf32, #tpu.memory_space<vmem>>, vector<32x2xf32>
    %cst_24 = arith.constant dense<0.000000e+00> : vector<1x2xf32>
    %39 = tpu.matmul %37, %38, %cst_24 {dimension_numbers = #tpu.dot_dimension_numbers<[1], [0], [0], [1], [0, 0, 1, 1], [], []>} : vector<1x32xf32>, vector<32x2xf32>, vector<1x2xf32> -> vector<1x2xf32>
    %c0_25 = arith.constant 0 : index
    %c0_26 = arith.constant 0 : index
    %40 = vector.load %arg9[%c0_25, %c0_26] : memref<1x2xf32, #tpu.memory_space<vmem>>, vector<1x2xf32>
    %41 = arith.addf %39, %40 : vector<1x2xf32>
    %cst_27 = arith.constant 0.000000e+00 : f32
    %42 = vector.broadcast %cst_27 : f32 to vector<1x2xf32>
    %43 = arith.maximumf %41, %42 : vector<1x2xf32>
    %c0_28 = arith.constant 0 : index
    %c0_29 = arith.constant 0 : index
    %44 = vector.load %arg10[%c0_28, %c0_29] : memref<2x32xf32, #tpu.memory_space<vmem>>, vector<2x32xf32>
    %cst_30 = arith.constant dense<0.000000e+00> : vector<1x32xf32>
    %45 = tpu.matmul %43, %44, %cst_30 {dimension_numbers = #tpu.dot_dimension_numbers<[1], [0], [0], [1], [0, 0, 1, 1], [], []>} : vector<1x2xf32>, vector<2x32xf32>, vector<1x32xf32> -> vector<1x32xf32>
    %c0_31 = arith.constant 0 : index
    %c0_32 = arith.constant 0 : index
    %46 = vector.load %arg11[%c0_31, %c0_32] : memref<1x32xf32, #tpu.memory_space<vmem>>, vector<1x32xf32>
    %47 = arith.addf %45, %46 : vector<1x32xf32>
    %48 = arith.negf %47 : vector<1x32xf32>
    %49 = math.exp %48 : vector<1x32xf32>
    %cst_33 = arith.constant 1.000000e+00 : f32
    %50 = vector.broadcast %cst_33 : f32 to vector<1x32xf32>
    %51 = arith.addf %50, %49 : vector<1x32xf32>
    %52 = arith.divf %50, %51 : vector<1x32xf32>
    %53 = vector.broadcast %52 : vector<1x32xf32> to vector<64x32xf32>
    %54 = arith.mulf %33, %53 : vector<64x32xf32>
    %55 = arith.addf %54, %3 : vector<64x32xf32>
    %c0_34 = arith.constant 0 : index
    %c0_35 = arith.constant 0 : index
    %c0_36 = arith.constant 0 : index
    %56 = vector.load %arg12[%c0_34, %c0_35, %c0_36] : memref<1x64x32xf32, #tpu.memory_space<vmem>>, vector<1x64x32xf32>
    %57 = vector.shape_cast %56 : vector<1x64x32xf32> to vector<64x32xf32>
    %58 = vector.shape_cast %55 : vector<64x32xf32> to vector<1x64x32xf32>
    tpu.vector_store %arg12[%c0_34, %c0_35, %c0_36], %58 {strides = array<i32>} : memref<1x64x32xf32, #tpu.memory_space<vmem>>, vector<1x64x32xf32>,
    return
  }
  func.func @transform_0(%arg0: i32) -> (i32, i32, i32) {
    %c0_i32 = arith.constant 0 : i32
    %c0_i32_0 = arith.constant 0 : i32
    %c0_i32_1 = arith.constant 0 : i32
    return %arg0, %c0_i32, %c0_i32_0 : i32, i32, i32
  }
  func.func @transform_1(%arg0: i32) -> (i32, i32, i32) {
    %c0_i32 = arith.constant 0 : i32
    %c0_i32_0 = arith.constant 0 : i32
    %c0_i32_1 = arith.constant 0 : i32
    return %arg0, %c0_i32, %c0_i32_0 : i32, i32, i32
  }
  func.func @transform_2(%arg0: i32) -> (i32, i32) {
    %c0_i32 = arith.constant 0 : i32
    %c0_i32_0 = arith.constant 0 : i32
    %c0_i32_1 = arith.constant 0 : i32
    return %c0_i32, %c0_i32_0 : i32, i32
  }
  func.func @transform_3(%arg0: i32) -> (i32, i32) {
    %c0_i32 = arith.constant 0 : i32
    %c0_i32_0 = arith.constant 0 : i32
    %c0_i32_1 = arith.constant 0 : i32
    return %c0_i32, %c0_i32_0 : i32, i32
  }
  func.func @transform_4(%arg0: i32) -> (i32, i32) {
    %c0_i32 = arith.constant 0 : i32
    %c0_i32_0 = arith.constant 0 : i32
    %c0_i32_1 = arith.constant 0 : i32
    return %c0_i32, %c0_i32_0 : i32, i32
  }
  func.func @transform_5(%arg0: i32) -> (i32, i32) {
    %c0_i32 = arith.constant 0 : i32
    %c0_i32_0 = arith.constant 0 : i32
    %c0_i32_1 = arith.constant 0 : i32
    return %c0_i32, %c0_i32_0 : i32, i32
  }
  func.func @transform_6(%arg0: i32) -> (i32, i32) {
    %c0_i32 = arith.constant 0 : i32
    %c0_i32_0 = arith.constant 0 : i32
    %c0_i32_1 = arith.constant 0 : i32
    return %c0_i32, %c0_i32_0 : i32, i32
  }
  func.func @transform_7(%arg0: i32) -> (i32, i32) {
    %c0_i32 = arith.constant 0 : i32
    %c0_i32_0 = arith.constant 0 : i32
    %c0_i32_1 = arith.constant 0 : i32
    return %c0_i32, %c0_i32_0 : i32, i32
  }
  func.func @transform_8(%arg0: i32) -> (i32, i32) {
    %c0_i32 = arith.constant 0 : i32
    %c0_i32_0 = arith.constant 0 : i32
    %c0_i32_1 = arith.constant 0 : i32
    return %c0_i32, %c0_i32_0 : i32, i32
  }
  func.func @transform_9(%arg0: i32) -> (i32, i32) {
    %c0_i32 = arith.constant 0 : i32
    %c0_i32_0 = arith.constant 0 : i32
    %c0_i32_1 = arith.constant 0 : i32
    return %c0_i32, %c0_i32_0 : i32, i32
  }
  func.func @transform_10(%arg0: i32) -> (i32, i32) {
    %c0_i32 = arith.constant 0 : i32
    %c0_i32_0 = arith.constant 0 : i32
    %c0_i32_1 = arith.constant 0 : i32
    return %c0_i32, %c0_i32_0 : i32, i32
  }
  func.func @transform_11(%arg0: i32) -> (i32, i32, i32) {
    %c0_i32 = arith.constant 0 : i32
    %c0_i32_0 = arith.constant 0 : i32
    %c0_i32_1 = arith.constant 0 : i32
    return %arg0, %c0_i32, %c0_i32_0 : i32, i32, i32
  }
}

</mosaic_0001>

<bundles_post_ra>
// kernel: tpu_custom_call.1
= control target key start
LH: loop header
LB: loop body
LE: loop exit
PB: predicated region body
PF: predicated region fallthrough
CT: control target
= control target key end

     0   :  { %s3591_s17 = smov 0   ;;  %s4357_s0 = inlined_call_operand.vmem [shape: f32[2,256,16], index: 0, kind: input, shape index: {}]   ;;  %s4358_s1 = inlined_call_operand.vmem [shape: f32[2,64,32], index: 1, kind: input, shape index: {}]   ;;  %s4359_s2 = inlined_call_operand.vmem [shape: f32[16,32], index: 2, kind: input, shape index: {}]   ;;  %s4360_s3 = inlined_call_operand.vmem [shape: f32[1,32], index: 3, kind: input, shape index: {}]   ;;  %s4361_s4 = inlined_call_operand.vmem [shape: f32[32,32], index: 4, kind: input, shape index: {}]   ;;  %s4362_s5 = inlined_call_operand.vmem [shape: f32[32,32], index: 5, kind: input, shape index: {}]   ;;  %s4363_s6 = inlined_call_operand.vmem [shape: f32[1,32], index: 6, kind: input, shape index: {}]   ;;  %s4364_s7 = inlined_call_operand.vmem [shape: f32[32,2], index: 7, kind: input, shape index: {}]   ;;  %s4365_s8 = inlined_call_operand.vmem [shape: f32[1,2], index: 8, kind: input, shape index: {}]   ;;  %s4366_s9 = inlined_call_operand.vmem [shape: f32[2,32], index: 9, kind: input, shape index: {}]   ;;  %s4367_s10 = inlined_call_operand.vmem [shape: f32[1,32], index: 10, kind: input, shape index: {}]   ;;  %s4368_s11 = inlined_call_operand.vmem [shape: f32[2,64,32], index: 11, kind: output, shape index: {}]  }
   0x1 LB: > { %s3090_s18 = sadd.s32 4294967295, %s3525_s17   ;;  %p3094_p0 = scmp.ge.s32.totalorder %s3525_s17, 1  ;;  %s3525_s17 = sphi %s3591_s17, %s21_s17  }
   0x2   : > { %p347_p1 = scmp.lt.s32.totalorder %s3525_s17, 3 }
   0x4   : > { %p348_p2 = pnand %p3094_p0, %p347_p1 }
   0x6   : > { %351 = sbr.rel (%p348_p2) target bundleno = 1228 (0x4cc), region = 64 }
   0xb   : > { %v448_v0 = vld [vmem:[%s4359_s2 + $0x8] sm:$0xff]  ;;  %v447_v1 = vld [vmem:[%s4359_s2] sm:$0xff]  ;;  %p392_p3 = scmp.lt.s32.totalorder %s3090_s18, 1  ;;  %vm456_vm0 = vcmask 130048   ;;  %v2097_v34 = vld [vmem:[%s4362_s5 + $0x18] sm:$0xff]  ;;  %vm2098_vm1 = vcmask 261120   ;;  %v846_v52 = vlaneseq }
   0xc   : > { %3363 = vmatprep.subr.mxu0 %v448_v0  ;;  %3490 = vmatprep.subr.mxu1 %v448_v0  ;;  %v2096_v35 = vld [vmem:[%s4362_s5 + $0x10] sm:$0xff]  ;;  %v2095_v36 = vld [vmem:[%s4362_s5 + $0x8] sm:$0xff]  ;;  %v2094_v37 = vld [vmem:[%s4362_s5] sm:$0xff]  ;;  %v3527_v50 = vmov 1983009808   ;;  %vm2548_vm2 = vcmask 1041409  }
   0xd   : > { %3364 = vmatpush3.msra.mxu0 %v448_v0  ;;  %s4417_s18 = smov (!%p392_p3, %s3090_s18), 1  ;;  %3492 = vmatpush3.msra.mxu1 %v448_v0  ;;  %v2093_v46 = vld [vmem:[%s4361_s4 + $0x18] sm:$0xff]  ;;  %v2092_v47 = vld [vmem:[%s4361_s4 + $0x10] sm:$0xff]  ;;  %v2091_v48 = vld [vmem:[%s4361_s4 + $0x8] sm:$0xff]  ;;  %v844_v51 = vunpack.c.l.s4 %v3527_v50  ;;  %v847_v54 = vshrl.u32 %v846_v52, 7  ;;  %vm2550_vm3 = vcmask 1042434  }
   0xe   : > { %3365 = vmatprep.subr.mxu0 %v447_v1  ;;  %3491 = vmatprep.subr.mxu1 %v447_v1  ;;  %s3286_s23 = sshll.u32 %s4417_s18, 8  ;;  %s3287_s16 = sshll.u32 %s4417_s18, 6  ;;  %v2090_v49 = vld [vmem:[%s4361_s4] sm:$0xff]  ;;  %vm2552_vm4 = vcmask 1043459   ;;  %vm2554_vm5 = vcmask 1044484   ;;  %vm2556_vm6 = vcmask 1045509  }
   0xf   : > { %3366 = vmatpush3.msra.mxu0 %v447_v1  ;;  %3493 = vmatpush3.msra.mxu1 %v447_v1  ;;  %s3611_s26 = scalar_lea.vmem %s4357_s0, %s3286_s23  ;;  %s3695_s21 = scalar_lea.vmem %s4358_s1, %s3287_s16  ;;  %v845_v53 = vunpack.c.0.s8 %v844_v51  ;;  %v3728_v55 = vld [vmem:[%s4360_s3] ss:$0 sm:$0xff]  ;;  %vm2558_vm7 = vcmask 1046534   ;;  %vm2560_vm8 = vcmask 1047559   ;;  %vm3529_vm9 = vmmov 0  }
  0x10   : > { %v407_v2 = vld [vmem:[%s3611_s26] sm:$0xff]  ;;  %v408_v3 = vld [vmem:[%s3611_s26 + $0x8] sm:$0xff]  ;;  %v409_v4 = vld [vmem:[%s3611_s26 + $0x10] sm:$0xff]  ;;  %3415 = vmatprep.subr.mxu1 %v2097_v34  ;;  %vm2755_vm10 = vcmask 523264   ;;  %vm2915_vm11 = vcmask 1041408   ;;  %vm2911_vm12 = vcmask 15360   ;;  %s406_s22 = scalar_lea.vmem %s4368_s11, %s3287_s16 }
  0x11   : > { %3367 = vmatprep.mubr.msk.f32.mxu0 %vm456_vm0, %v407_v2  ;;  %v410_v5 = vld [vmem:[%s3611_s26 + $0x18] sm:$0xff]  ;;  %v411_v6 = vld [vmem:[%s3611_s26 + $0x20] sm:$0xff]  ;;  %v412_v8 = vld [vmem:[%s3611_s26 + $0x28] sm:$0xff]  ;;  %v3731_v58 = vsub.s32 %v845_v53, %v847_v54 }
  0x12   : > { %3368 = vmatmul.mubr.msk.f32.vlgmr.msra.gmra.mxu0 %vm456_vm0, %v408_v3  ;;  %v435_v7 = vld [vmem:[%s3611_s26 + $0xe0] sm:$0xff]  ;;  %v436_v9 = vld [vmem:[%s3611_s26 + $0xe8] sm:$0xff]  ;;  %v437_v10 = vld [vmem:[%s3611_s26 + $0xf0] sm:$0xff]  ;;  %v3736_v3 = vsub.s32 0, %v847_v54 }
  0x13   : > { %3370 = vmatprep.mubr.msk.f32.mxu0 %vm456_vm0, %v409_v4  ;;  %3409 = vmatprep.mubr.msk.f32.mxu1 %vm456_vm0, %v435_v7  ;;  %v413_v11 = vld [vmem:[%s3611_s26 + $0x30] sm:$0xff]  ;;  %v438_v12 = vld [vmem:[%s3611_s26 + $0xf8] sm:$0xff]  ;;  %v415_v14 = vld [vmem:[%s3611_s26 + $0x40] sm:$0xff] }
  0x14   : > { %3410 = vmatmul.mubr.msk.f32.vlgmr.msra.gmra.mxu1 %vm456_vm0, %v436_v9  ;;  %v414_v13 = vld [vmem:[%s3611_s26 + $0x38] sm:$0xff]  ;;  %v416_v15 = vld [vmem:[%s3611_s26 + $0x48] sm:$0xff]  ;;  %v417_v16 = vld [vmem:[%s3611_s26 + $0x50] sm:$0xff] }
  0x15   : > { %3412 = vmatprep.mubr.msk.f32.mxu1 %vm456_vm0, %v437_v10  ;;  %v418_v17 = vld [vmem:[%s3611_s26 + $0x58] sm:$0xff]  ;;  %v419_v18 = vld [vmem:[%s3611_s26 + $0x60] sm:$0xff]  ;;  %v420_v19 = vld [vmem:[%s3611_s26 + $0x68] sm:$0xff]  ;;  %3416 = vmatpush3.msra.mxu1 %v2097_v34 }
  0x16   : > { %3371 = vmatmul.mubr.msk.f32.gmra.mxu0 %vm456_vm0, %v410_v5  ;;  %v421_v20 = vld [vmem:[%s3611_s26 + $0x70] sm:$0xff]  ;;  %v422_v21 = vld [vmem:[%s3611_s26 + $0x78] sm:$0xff]  ;;  %v423_v22 = vld [vmem:[%s3611_s26 + $0x80] sm:$0xff]  ;;  %3417 = vmatprep.subr.mxu1 %v2096_v35 }
  0x17   : > { %3373 = vmatprep.mubr.msk.f32.mxu0 %vm456_vm0, %v411_v6  ;;  %v424_v23 = vld [vmem:[%s3611_s26 + $0x88] sm:$0xff]  ;;  %v425_v24 = vld [vmem:[%s3611_s26 + $0x90] sm:$0xff]  ;;  %v426_v25 = vld [vmem:[%s3611_s26 + $0x98] sm:$0xff]  ;;  %3418 = vmatpush3.msra.mxu1 %v2096_v35 }
  0x18   : > { %3413 = vmatmul.mubr.msk.f32.gmra.mxu1 %vm456_vm0, %v438_v12  ;;  %v427_v26 = vld [vmem:[%s3611_s26 + $0xa0] sm:$0xff]  ;;  %v428_v27 = vld [vmem:[%s3611_s26 + $0xa8] sm:$0xff]  ;;  %v429_v28 = vld [vmem:[%s3611_s26 + $0xb0] sm:$0xff]  ;;  %3419 = vmatprep.subr.mxu1 %v2095_v36 }
  0x19   : > { %v430_v29 = vld [vmem:[%s3611_s26 + $0xb8] sm:$0xff]  ;;  %v431_v30 = vld [vmem:[%s3611_s26 + $0xc0] sm:$0xff]  ;;  %v432_v31 = vld [vmem:[%s3611_s26 + $0xc8] sm:$0xff]  ;;  %3420 = vmatpush3.msra.mxu1 %v2095_v36 }
  0x1a   : > { %3374 = vmatmul.mubr.msk.f32.gmra.mxu0 %vm456_vm0, %v412_v8  ;;  %v433_v32 = vld [vmem:[%s3611_s26 + $0xd0] sm:$0xff]  ;;  %v434_v33 = vld [vmem:[%s3611_s26 + $0xd8] sm:$0xff]  ;;  %3421 = vmatprep.subr.mxu1 %v2094_v37  ;;  %v439_v38 = vld [vmem:[%s3695_s21] sm:$0xff] }
  0x1b   : > { %3376 = vmatprep.mubr.msk.f32.mxu0 %vm456_vm0, %v413_v11  ;;  %3422 = vmatpush3.msra.mxu1 %v2094_v37  ;;  %v440_v39 = vld [vmem:[%s3695_s21 + $0x8] sm:$0xff]  ;;  %v441_v40 = vld [vmem:[%s3695_s21 + $0x10] sm:$0xff]  ;;  %v442_v41 = vld [vmem:[%s3695_s21 + $0x18] sm:$0xff] }
  0x1c   : > { %3423 = vmatprep.mubr.msk.f32.mxu1 %vm2098_vm1, %v439_v38  ;;  %v443_v42 = vld [vmem:[%s3695_s21 + $0x20] sm:$0xff]  ;;  %v444_v43 = vld [vmem:[%s3695_s21 + $0x28] sm:$0xff]  ;;  %v445_v44 = vld [vmem:[%s3695_s21 + $0x30] sm:$0xff]  ;;  %3435 = vmatprep.subr.mxu1 %v2093_v46 }
  0x1d   : > { %3424 = vmatmul.mubr.msk.f32.vlgmr.msra.gmra.mxu1 %vm2098_vm1, %v440_v39  ;;  %v446_v45 = vld [vmem:[%s3695_s21 + $0x38] sm:$0xff] }
  0x1e   : > { %3377 = vmatmul.mubr.msk.f32.gmra.mxu0 %vm456_vm0, %v414_v13  ;;  %3426 = vmatprep.mubr.msk.f32.mxu1 %vm2098_vm1, %v441_v40 }
  0x1f   : > { %3379 = vmatprep.mubr.msk.f32.mxu0 %vm456_vm0, %v415_v14  ;;  %3436 = vmatpush3.msra.mxu1 %v2093_v46 }
  0x20   : > { %3437 = vmatprep.subr.mxu1 %v2092_v47 }
  0x21   : > { %3427 = vmatmul.mubr.msk.f32.gmra.mxu1 %vm2098_vm1, %v442_v41 }
  0x22   : > { %3380 = vmatmul.mubr.msk.f32.gmra.mxu0 %vm456_vm0, %v416_v15  ;;  %3429 = vmatprep.mubr.msk.f32.mxu1 %vm2098_vm1, %v443_v42 }
  0x23   : > { %3382 = vmatprep.mubr.msk.f32.mxu0 %vm456_vm0, %v417_v16  ;;  %3438 = vmatpush3.msra.mxu1 %v2092_v47 }
  0x24   : > { %3439 = vmatprep.subr.mxu1 %v2091_v48 }
  0x25   : > { %3430 = vmatmul.mubr.msk.f32.gmra.mxu1 %vm2098_vm1, %v444_v43 }
  0x26   : > { %3383 = vmatmul.mubr.msk.f32.gmra.mxu0 %vm456_vm0, %v418_v17  ;;  %3432 = vmatprep.mubr.msk.f32.mxu1 %vm2098_vm1, %v445_v44 }
  0x27   : > { %3385 = vmatprep.mubr.msk.f32.mxu0 %vm456_vm0, %v419_v18  ;;  %3440 = vmatpush3.msra.mxu1 %v2091_v48 }
  0x28   : > { %3441 = vmatprep.subr.mxu1 %v2090_v49 }
  0x29   : > { %3433 = vmatmul.mubr.msk.f32.gmra.mxu1 %vm2098_vm1, %v446_v45 }
  0x2a   : > { %3386 = vmatmul.mubr.msk.f32.gmra.mxu0 %vm456_vm0, %v420_v19  ;;  %3442 = vmatpush3.msra.mxu1 %v2090_v49 }
  0x2b   : > { %3388 = vmatprep.mubr.msk.f32.mxu0 %vm456_vm0, %v421_v20 }
  0x2e   : > { %3389 = vmatmul.mubr.msk.f32.gmra.mxu0 %vm456_vm0, %v422_v21 }
  0x2f   : > { %3391 = vmatprep.mubr.msk.f32.mxu0 %vm456_vm0, %v423_v22 }
  0x32   : > { %3392 = vmatmul.mubr.msk.f32.gmra.mxu0 %vm456_vm0, %v424_v23 }
  0x33   : > { %3394 = vmatprep.mubr.msk.f32.mxu0 %vm456_vm0, %v425_v24 }
  0x36   : > { %3395 = vmatmul.mubr.msk.f32.gmra.mxu0 %vm456_vm0, %v426_v25 }
  0x37   : > { %3397 = vmatprep.mubr.msk.f32.mxu0 %vm456_vm0, %v427_v26 }
  0x3a   : > { %3398 = vmatmul.mubr.msk.f32.gmra.mxu0 %vm456_vm0, %v428_v27 }
  0x3b   : > { %3400 = vmatprep.mubr.msk.f32.mxu0 %vm456_vm0, %v429_v28 }
  0x3e   : > { %3401 = vmatmul.mubr.msk.f32.gmra.mxu0 %vm456_vm0, %v430_v29 }
  0x3f   : > { %3403 = vmatprep.mubr.msk.f32.mxu0 %vm456_vm0, %v431_v30 }
  0x42   : > { %3404 = vmatmul.mubr.msk.f32.gmra.mxu0 %vm456_vm0, %v432_v31 }
  0x43   : > { %3406 = vmatprep.mubr.msk.f32.mxu0 %vm456_vm0, %v433_v32 }
  0x46   : > { %3407 = vmatmul.mubr.msk.f32.gmra.mxu0 %vm456_vm0, %v434_v33 }
  0xd2   : > { %v3369_v56 = vpop.f32.mrf.mxu0 }
  0xd3   : > { %v625_v57 = vadd.f32 %v3369_v56, %v3728_v55 }
  0xd4   : > { %v619_v59 = vpop.f32.mrf.mxu0  ;;  %v3411_v9 = vpop.f32.mrf.mxu1 }
  0xd5   : > { %v779_v60 = vmax.f32 %v625_v57, 0.0  ;;  %v620_v61 = vadd.f32 %v3728_v55, %v619_v59  ;;  %v3742_v13 = vadd.f32 %v3411_v9, %v3728_v55 }
  0xd6   : > { %v3372_v62 = vpop.f32.mrf.mxu0 }
  0xd7   : > { %v859_v63 = vcombine.high %v779_v60, %v779_v60  ;;  %v866_v0 = vrot.slane %v779_v60, %v3731_v58  ;;  %v778_v1 = vmax.f32 %v620_v61, 0.0  ;;  %v635_v2 = vadd.f32 %v3372_v62, %v3728_v55 }
  0xd8   : > { %v629_v4 = vpop.f32.mrf.mxu0 }
  0xd9   : > { %v873_v5 = vrot.slane %v859_v63, %v3731_v58  ;;  %v874_v6 = vcombine.high %v866_v0, %v866_v0  ;;  %v3138_v7 = vrot.slane %v866_v0, 9  ;;  %v842_v8 = vcombine.high %v778_v1, %v778_v1 }
  0xda   : > { %v849_v10 = vrot.slane %v778_v1, %v3731_v58  ;;  %v781_v11 = vmax.f32 %v635_v2, 0.0  ;;  %v630_v12 = vadd.f32 %v3728_v55, %v629_v4  ;;  %v3375_v22 = vpop.f32.mrf.mxu0 }
  0xdb   : > { %v875_v14 = vcombine.high %v873_v5, %v873_v5  ;;  %v3139_v15 = vrot.slane %v874_v6, 9  ;;  %v3140_v16 = vrot.slane %v873_v5, 9  ;;  %v1902_v17 = vmax.f32 %v866_v0, %v3138_v7 }
  0xdc   : > { %v856_v18 = vrot.slane %v842_v8, %v3731_v58  ;;  %v857_v19 = vcombine.high %v849_v10, %v849_v10  ;;  %v3134_v20 = vrot.slane %v849_v10, 9  ;;  %v893_v21 = vcombine.high %v781_v11, %v781_v11  ;;  %v639_v39 = vpop.f32.mrf.mxu0 }
  0xdd   : > { %v3141_v23 = vrot.slane %v875_v14, 9  ;;  %v3745_v24 = vmax.f32 %v874_v6, %v3139_v15  ;;  %v3747_v25 = vmax.f32 %v873_v5, %v3140_v16  ;;  %v900_v26 = vrot.slane %v781_v11, %v3731_v58 }
  0xde   : > { %v858_v27 = vcombine.high %v856_v18, %v856_v18  ;;  %v3135_v28 = vrot.slane %v857_v19, 9  ;;  %v3136_v29 = vrot.slane %v856_v18, 9  ;;  %v1898_v30 = vmax.f32 %v849_v10, %v3134_v20  ;;  %v3378_v57 = vpop.f32.mrf.mxu0 }
  0xdf   : > { %v3750_v31 = vmax.f32 %v875_v14, %v3141_v23  ;;  %v907_v32 = vrot.slane %v893_v21, %v3731_v58  ;;  %v908_v33 = vcombine.high %v900_v26, %v900_v26  ;;  %v3146_v34 = vrot.slane %v900_v26, 9 }
  0xe0   : > { %v3137_v35 = vrot.slane %v858_v27, 9  ;;  %v1899_v36 = vmax.f32 %v857_v19, %v3135_v28  ;;  %v1900_v37 = vmax.f32 %v856_v18, %v3136_v29  ;;  %v780_v38 = vmax.f32 %v630_v12, 0.0 }
  0xe1   : > { %v909_v40 = vcombine.high %v907_v32, %v907_v32  ;;  %v3147_v41 = vrot.slane %v908_v33, 9  ;;  %v3148_v42 = vrot.slane %v907_v32, 9  ;;  %v1910_v43 = vmax.f32 %v900_v26, %v3146_v34 }
  0xe2   : > { %v1901_v44 = vmax.f32 %v858_v27, %v3137_v35  ;;  %v876_v45 = vcombine.high %v780_v38, %v780_v38  ;;  %v883_v46 = vrot.slane %v780_v38, %v3731_v58  ;;  %v645_v47 = vadd.f32 %v3375_v22, %v3728_v55 }
  0xe3   : > { %v3149_v48 = vrot.slane %v909_v40, 9  ;;  %v3755_v49 = vmax.f32 %v908_v33, %v3147_v41  ;;  %v3757_v50 = vmax.f32 %v907_v32, %v3148_v42  ;;  %v2030_v51 = vmax.f32 %v1902_v17, %v1910_v43  ;;  %v649_v17 = vpop.f32.mrf.mxu0 }
  0xe4   : > { %v890_v52 = vrot.slane %v876_v45, %v3731_v58  ;;  %v891_v53 = vcombine.high %v883_v46, %v883_v46  ;;  %v3142_v54 = vrot.slane %v883_v46, 9  ;;  %v783_v56 = vmax.f32 %v645_v47, 0.0 }
  0xe5   : > { %v3760_v59 = vmax.f32 %v909_v40, %v3149_v48  ;;  %v2031_v60 = vmax.f32 %v3745_v24, %v3755_v49  ;;  %v2032_v61 = vmax.f32 %v3747_v25, %v3757_v50  ;;  %v3767_v62 = vrot.slane %v2030_v51, %v3736_v3 }
  0xe6   : > { %v892_v63 = vcombine.high %v890_v52, %v890_v52  ;;  %v3143_v0 = vrot.slane %v891_v53, 9  ;;  %v3144_v1 = vrot.slane %v890_v52, 9  ;;  %v1906_v2 = vmax.f32 %v883_v46, %v3142_v54 }
  0xe7   : > { %v927_v4 = vcombine.high %v783_v56, %v783_v56  ;;  %v934_v5 = vrot.slane %v783_v56, %v3731_v58  ;;  %v640_v6 = vadd.f32 %v3728_v55, %v639_v39  ;;  %v655_v7 = vadd.f32 %v3378_v57, %v3728_v55 }
  0xe8   : > { %v3145_v8 = vrot.slane %v892_v63, 9  ;;  %v1907_v9 = vmax.f32 %v891_v53, %v3143_v0  ;;  %v1908_v10 = vmax.f32 %v890_v52, %v3144_v1  ;;  %v2026_v11 = vmax.f32 %v1898_v30, %v1906_v2 }
  0xe9   : > { %v941_v12 = vrot.slane %v927_v4, %v3731_v58  ;;  %v942_v14 = vcombine.high %v934_v5, %v934_v5  ;;  %v3154_v15 = vrot.slane %v934_v5, 9  ;;  %v782_v16 = vmax.f32 %v640_v6, 0.0 }
  0xea   : > { %v1909_v18 = vmax.f32 %v892_v63, %v3145_v8  ;;  %v2027_v19 = vmax.f32 %v1899_v36, %v1907_v9  ;;  %v2028_v20 = vmax.f32 %v1900_v37, %v1908_v10  ;;  %v2295_v21 = vrot.slane %v2026_v11, %v3736_v3  ;;  %v3381_v36 = vpop.f32.mrf.mxu0 }
  0xeb   : > { %v943_v22 = vcombine.high %v941_v12, %v941_v12  ;;  %v3155_v23 = vrot.slane %v942_v14, 9  ;;  %v3156_v26 = vrot.slane %v941_v12, 9  ;;  %v1918_v27 = vmax.f32 %v934_v5, %v3154_v15 }
  0xec   : > { %v2029_v28 = vmax.f32 %v1901_v44, %v1909_v18  ;;  %v2299_v29 = vrot.slane %v2027_v19, %v3736_v3  ;;  %v3776_v30 = vrot.slane %v2028_v20, %v3736_v3  ;;  %v910_v32 = vcombine.high %v782_v16, %v782_v16  ;;  %v659_v57 = vpop.f32.mrf.mxu0 }
  0xed   : > { %v3157_v33 = vrot.slane %v943_v22, 9  ;;  %v1919_v34 = vmax.f32 %v942_v14, %v3155_v23  ;;  %v1920_v35 = vmax.f32 %v941_v12, %v3156_v26  ;;  %v917_v38 = vrot.slane %v782_v16, %v3731_v58 }
  0xee   : > { %v3780_v37 = vrot.slane %v2029_v28, %v3736_v3  ;;  %v3783_v39 = vsel %vm2548_vm2, %v2299_v29, %v2295_v21  ;;  %v924_v40 = vrot.slane %v910_v32, %v3731_v58  ;;  %v785_v41 = vmax.f32 %v655_v7, 0.0 }
  0xef   : > { %v3786_v42 = vmax.f32 %v943_v22, %v3157_v33  ;;  %v925_v43 = vcombine.high %v917_v38, %v917_v38  ;;  %v3150_v44 = vrot.slane %v917_v38, 9  ;;  %v650_v45 = vadd.f32 %v3728_v55, %v649_v17  ;;  %v3384_v17 = vpop.f32.mrf.mxu0 }
  0xf0   : > { %v926_v46 = vcombine.high %v924_v40, %v924_v40  ;;  %v3152_v47 = vrot.slane %v924_v40, 9  ;;  %v961_v48 = vcombine.high %v785_v41, %v785_v41  ;;  %v968_v51 = vrot.slane %v785_v41, %v3731_v58 }
  0xf1   : > { %v3151_v52 = vrot.slane %v925_v43, 9  ;;  %v1914_v53 = vmax.f32 %v917_v38, %v3150_v44  ;;  %v784_v54 = vmax.f32 %v650_v45, 0.0  ;;  %v665_v56 = vadd.f32 %v3381_v36, %v3728_v55  ;;  %v669_v44 = vpop.f32.mrf.mxu0 }
  0xf2   : > { %v3153_v63 = vrot.slane %v926_v46, 9  ;;  %v1916_v0 = vmax.f32 %v924_v40, %v3152_v47  ;;  %v975_v1 = vrot.slane %v961_v48, %v3731_v58  ;;  %v976_v2 = vcombine.high %v968_v51, %v968_v51 }
  0xf3   : > { %v1915_v4 = vmax.f32 %v925_v43, %v3151_v52  ;;  %v3162_v5 = vrot.slane %v968_v51, 9  ;;  %v944_v6 = vcombine.high %v784_v54, %v784_v54  ;;  %v951_v7 = vrot.slane %v784_v54, %v3731_v58 }
  0xf4   : > { %v1917_v8 = vmax.f32 %v926_v46, %v3153_v63  ;;  %v977_v9 = vcombine.high %v975_v1, %v975_v1  ;;  %v3163_v10 = vrot.slane %v976_v2, 9  ;;  %v3164_v11 = vrot.slane %v975_v1, 9 }
  0xf5   : > { %v1926_v12 = vmax.f32 %v968_v51, %v3162_v5  ;;  %v958_v14 = vrot.slane %v944_v6, %v3731_v58  ;;  %v959_v15 = vcombine.high %v951_v7, %v951_v7  ;;  %v3158_v16 = vrot.slane %v951_v7, 9 }
  0xf6   : > { %v3165_v18 = vrot.slane %v977_v9, 9  ;;  %v1927_v19 = vmax.f32 %v976_v2, %v3163_v10  ;;  %v1928_v20 = vmax.f32 %v975_v1, %v3164_v11  ;;  %v787_v21 = vmax.f32 %v665_v56, 0.0 }
  0xf7   : > { %v2038_v22 = vmax.f32 %v1918_v27, %v1926_v12  ;;  %v960_v23 = vcombine.high %v958_v14, %v958_v14  ;;  %v3159_v26 = vrot.slane %v959_v15, 9  ;;  %v3160_v28 = vrot.slane %v958_v14, 9 }
  0xf8   : > { %v3794_v29 = vmax.f32 %v977_v9, %v3165_v18  ;;  %v2039_v32 = vmax.f32 %v1919_v34, %v1927_v19  ;;  %v2040_v33 = vmax.f32 %v1920_v35, %v1928_v20  ;;  %v1922_v38 = vmax.f32 %v951_v7, %v3158_v16 }
  0xf9   : > { %v3797_v36 = vrot.slane %v2038_v22, %v3736_v3  ;;  %v3161_v40 = vrot.slane %v960_v23, 9  ;;  %v1923_v41 = vmax.f32 %v959_v15, %v3159_v26  ;;  %v1924_v43 = vmax.f32 %v958_v14, %v3160_v28 }
  0xfa   : > { %v3802_v27 = vrot.slane %v2039_v32, %v3736_v3  ;;  %v3805_v46 = vrot.slane %v2040_v33, %v3736_v3  ;;  %v2034_v47 = vmax.f32 %v1914_v53, %v1922_v38  ;;  %v995_v51 = vcombine.high %v787_v21, %v787_v21  ;;  %v3387_v53 = vpop.f32.mrf.mxu0 }
  0xfb   : > { %v1925_v34 = vmax.f32 %v960_v23, %v3161_v40  ;;  %v2035_v35 = vmax.f32 %v1915_v4, %v1923_v41  ;;  %v2036_v48 = vmax.f32 %v1916_v0, %v1924_v43  ;;  %v1002_v54 = vrot.slane %v787_v21, %v3731_v58 }
  0xfc   : > { %v2327_v52 = vrot.slane %v2034_v47, %v3736_v3  ;;  %v660_v56 = vadd.f32 %v3728_v55, %v659_v57  ;;  %v675_v63 = vadd.f32 %v3384_v17, %v3728_v55  ;;  %v1009_v6 = vrot.slane %v995_v51, %v3731_v58  ;;  %v679_v21 = vpop.f32.mrf.mxu0 }
  0xfd   : > { %v2037_v1 = vmax.f32 %v1917_v8, %v1925_v34  ;;  %v2331_v2 = vrot.slane %v2035_v35, %v3736_v3  ;;  %v2335_v5 = vrot.slane %v2036_v48, %v3736_v3  ;;  %v1010_v7 = vcombine.high %v1002_v54, %v1002_v54 }
  0xfe   : > { %v3170_v4 = vrot.slane %v1002_v54, 9  ;;  %v786_v0 = vmax.f32 %v660_v56, 0.0  ;;  %v789_v9 = vmax.f32 %v675_v63, 0.0  ;;  %v1011_v57 = vcombine.high %v1009_v6, %v1009_v6 }
  0xff   : > { %v3815_v10 = vrot.slane %v2037_v1, %v3736_v3  ;;  %v2562_v11 = vsel %vm2548_vm2, %v2331_v2, %v2327_v52  ;;  %v3172_v12 = vrot.slane %v1009_v6, 9  ;;  %v3171_v14 = vrot.slane %v1010_v7, 9 }
 0x100   : > { %v3819_v8 = vsel %vm2550_vm3, %v2335_v5, %v2562_v11  ;;  %v1934_v15 = vmax.f32 %v1002_v54, %v3170_v4  ;;  %v978_v16 = vcombine.high %v786_v0, %v786_v0  ;;  %v3173_v17 = vrot.slane %v1011_v57, 9  ;;  %v3390_v54 = vpop.f32.mrf.mxu0 }
 0x101   : > { %v3821_v18 = vmax.f32 %v1009_v6, %v3172_v12  ;;  %v985_v19 = vrot.slane %v786_v0, %v3731_v58  ;;  %v1029_v20 = vcombine.high %v789_v9, %v789_v9  ;;  %v3824_v22 = vmax.f32 %v1010_v7, %v3171_v14 }
 0x102   : > { %v992_v23 = vrot.slane %v978_v16, %v3731_v58  ;;  %v1036_v26 = vrot.slane %v789_v9, %v3731_v58  ;;  %v670_v28 = vadd.f32 %v3728_v55, %v669_v44  ;;  %v3829_v32 = vmax.f32 %v1011_v57, %v3173_v17  ;;  %v689_v17 = vpop.f32.mrf.mxu0 }
 0x103   : > { %v993_v33 = vcombine.high %v985_v19, %v985_v19  ;;  %v3166_v38 = vrot.slane %v985_v19, 9  ;;  %v1043_v40 = vrot.slane %v1029_v20, %v3731_v58  ;;  %v685_v11 = vadd.f32 %v3387_v53, %v3728_v55 }
 0x104   : > { %v994_v41 = vcombine.high %v992_v23, %v992_v23  ;;  %v3168_v43 = vrot.slane %v992_v23, 9  ;;  %v1044_v47 = vcombine.high %v1036_v26, %v1036_v26  ;;  %v3178_v34 = vrot.slane %v1036_v26, 9 }
 0x105   : > { %v3167_v35 = vrot.slane %v993_v33, 9  ;;  %v1930_v48 = vmax.f32 %v985_v19, %v3166_v38  ;;  %v1045_v51 = vcombine.high %v1043_v40, %v1043_v40  ;;  %v3180_v52 = vrot.slane %v1043_v40, 9 }
 0x106   : > { %v3169_v56 = vrot.slane %v994_v41, 9  ;;  %v1932_v63 = vmax.f32 %v992_v23, %v3168_v43  ;;  %v3179_v1 = vrot.slane %v1044_v47, 9  ;;  %v1942_v2 = vmax.f32 %v1036_v26, %v3178_v34 }
 0x107   : > { %v1931_v44 = vmax.f32 %v993_v33, %v3167_v35  ;;  %v3181_v5 = vrot.slane %v1045_v51, 9  ;;  %v3832_v6 = vmax.f32 %v1043_v40, %v3180_v52  ;;  %v788_v7 = vmax.f32 %v670_v28, 0.0 }
 0x108   : > { %v1933_v4 = vmax.f32 %v994_v41, %v3169_v56  ;;  %v3834_v0 = vmax.f32 %v1044_v47, %v3179_v1  ;;  %v2046_v9 = vmax.f32 %v1934_v15, %v1942_v2  ;;  %v791_v23 = vmax.f32 %v685_v11, 0.0 }
 0x109   : > { %v3837_v57 = vmax.f32 %v1045_v51, %v3181_v5  ;;  %v1012_v14 = vcombine.high %v788_v7, %v788_v7  ;;  %v1019_v16 = vrot.slane %v788_v7, %v3731_v58  ;;  %v680_v15 = vadd.f32 %v3728_v55, %v679_v21 }
 0x10a   : > { %v3845_v20 = vrot.slane %v2046_v9, %v3736_v3  ;;  %v695_v33 = vadd.f32 %v3390_v54, %v3728_v55  ;;  %v1063_v38 = vcombine.high %v791_v23, %v791_v23  ;;  %v1070_v40 = vrot.slane %v791_v23, %v3731_v58 }
 0x10b   : > { %v1026_v53 = vrot.slane %v1012_v14, %v3731_v58  ;;  %v1027_v26 = vcombine.high %v1019_v16, %v1019_v16  ;;  %v3174_v28 = vrot.slane %v1019_v16, 9  ;;  %v790_v41 = vmax.f32 %v680_v15, 0.0 }
 0x10c   : > { %v690_v43 = vadd.f32 %v3728_v55, %v689_v17  ;;  %v1077_v52 = vrot.slane %v1063_v38, %v3731_v58  ;;  %v1078_v56 = vcombine.high %v1070_v40, %v1070_v40  ;;  %v3186_v21 = vrot.slane %v1070_v40, 9 }
 0x10d   : > { %v1028_v47 = vcombine.high %v1026_v53, %v1026_v53  ;;  %v3175_v34 = vrot.slane %v1027_v26, 9  ;;  %v3176_v35 = vrot.slane %v1026_v53, 9  ;;  %v1938_v51 = vmax.f32 %v1019_v16, %v3174_v28 }
 0x10e   : > { %v1046_v1 = vcombine.high %v790_v41, %v790_v41  ;;  %v1079_v54 = vcombine.high %v1077_v52, %v1077_v52  ;;  %v3187_v11 = vrot.slane %v1078_v56, 9  ;;  %v3188_v14 = vrot.slane %v1077_v52, 9 }
 0x10f   : > { %v3177_v2 = vrot.slane %v1028_v47, 9  ;;  %v1939_v5 = vmax.f32 %v1027_v26, %v3175_v34  ;;  %v1940_v7 = vmax.f32 %v1026_v53, %v3176_v35  ;;  %v2042_v9 = vmax.f32 %v1930_v48, %v1938_v51 }
 0x110   : > { %v3853_v23 = vmax.f32 %v1070_v40, %v3186_v21  ;;  %v3189_v16 = vrot.slane %v1079_v54, 9  ;;  %v3856_v28 = vmax.f32 %v1078_v56, %v3187_v11  ;;  %v3858_v38 = vmax.f32 %v1077_v52, %v3188_v14 }
 0x111   : > { %v1941_v15 = vmax.f32 %v1028_v47, %v3177_v2  ;;  %v2043_v17 = vmax.f32 %v1931_v44, %v1939_v5  ;;  %v2044_v12 = vmax.f32 %v1932_v63, %v1940_v7  ;;  %v2359_v19 = vrot.slane %v2042_v9, %v3736_v3 }
 0x112   : > { %v1053_v45 = vrot.slane %v790_v41, %v3731_v58  ;;  %v1060_v40 = vrot.slane %v1046_v1, %v3731_v58  ;;  %v3866_v47 = vmax.f32 %v1079_v54, %v3189_v16  ;;  %v793_v34 = vmax.f32 %v695_v33, 0.0  ;;  %v3393_v33 = vpop.f32.mrf.mxu0 }
 0x113   : > { %v2045_v26 = vmax.f32 %v1933_v4, %v1941_v15  ;;  %v2363_v48 = vrot.slane %v2043_v17, %v3736_v3  ;;  %v3863_v53 = vrot.slane %v2044_v12, %v3736_v3  ;;  %v792_v5 = vmax.f32 %v690_v43, 0.0 }
 0x114   : > { %v1061_v63 = vcombine.high %v1053_v45, %v1053_v45  ;;  %v3182_v44 = vrot.slane %v1053_v45, 9  ;;  %v1062_v41 = vcombine.high %v1060_v40, %v1060_v40  ;;  %v3184_v4 = vrot.slane %v1060_v40, 9 }
 0x115   : > { %v3869_v35 = vrot.slane %v2045_v26, %v3736_v3  ;;  %v3872_v51 = vsel %vm2548_vm2, %v2363_v48, %v2359_v19  ;;  %v1097_v21 = vcombine.high %v793_v34, %v793_v34  ;;  %v1104_v12 = vrot.slane %v793_v34, %v3731_v58 }
 0x116   : > { %v3183_v52 = vrot.slane %v1061_v63, 9  ;;  %v1946_v56 = vmax.f32 %v1053_v45, %v3182_v44  ;;  %v3185_v2 = vrot.slane %v1062_v41, 9  ;;  %v1948_v1 = vmax.f32 %v1060_v40, %v3184_v4  ;;  %v699_v44 = vpop.f32.mrf.mxu0 }
 0x117   : > { %v2033_v7 = vmax.f32 %v3750_v31, %v3760_v59  ;;  %v1111_v54 = vrot.slane %v1097_v21, %v3731_v58  ;;  %v1112_v19 = vcombine.high %v1104_v12, %v1104_v12  ;;  %v3194_v11 = vrot.slane %v1104_v12, 9 }
 0x118   : > { %v1947_v9 = vmax.f32 %v1061_v63, %v3183_v52  ;;  %v1949_v14 = vmax.f32 %v1062_v41, %v3185_v2  ;;  %v1080_v15 = vcombine.high %v792_v5, %v792_v5  ;;  %v1087_v45 = vrot.slane %v792_v5, %v3731_v58 }
 0x119   : > { %v2315_v43 = vrot.slane %v2031_v60, %v3736_v3  ;;  %v1113_v17 = vcombine.high %v1111_v54, %v1111_v54  ;;  %v3195_v31 = vrot.slane %v1112_v19, 9  ;;  %v3196_v59 = vrot.slane %v1111_v54, 9 }
 0x11a   : > { %v1958_v16 = vmax.f32 %v1104_v12, %v3194_v11  ;;  %v1094_v26 = vrot.slane %v1080_v15, %v3731_v58  ;;  %v1095_v48 = vcombine.high %v1087_v45, %v1087_v45  ;;  %v3190_v40 = vrot.slane %v1087_v45, 9 }
 0x11b   : > { %v2319_v63 = vrot.slane %v2032_v61, %v3736_v3  ;;  %v3197_v34 = vrot.slane %v1113_v17, 9  ;;  %v3888_v24 = vmax.f32 %v1112_v19, %v3195_v31  ;;  %v3890_v49 = vmax.f32 %v1111_v54, %v3196_v59 }
 0x11c   : > { %v2054_v60 = vmax.f32 %v3853_v23, %v1958_v16  ;;  %v1096_v41 = vcombine.high %v1094_v26, %v1094_v26  ;;  %v3191_v4 = vrot.slane %v1095_v48, 9  ;;  %v3192_v52 = vrot.slane %v1094_v26, 9  ;;  %v3396_v23 = vpop.f32.mrf.mxu0 }
 0x11d   : > { %v1954_v21 = vmax.f32 %v1087_v45, %v3190_v40  ;;  %v3893_v12 = vmax.f32 %v1113_v17, %v3197_v34  ;;  %v2323_v11 = vrot.slane %v2033_v7, %v3736_v3  ;;  %v2551_v15 = vsel %vm2550_vm3, %v3776_v30, %v3783_v39 }
 0x11e   : > { %v3900_v50 = vrot.slane %v2054_v60, %v3736_v3  ;;  %v3193_v61 = vrot.slane %v1096_v41, 9  ;;  %v1955_v5 = vmax.f32 %v1095_v48, %v3191_v4  ;;  %v1956_v54 = vmax.f32 %v1094_v26, %v3192_v52 }
 0x11f   : > { %v2050_v19 = vmax.f32 %v1946_v56, %v1954_v21  ;;  %v705_v45 = vadd.f32 %v3393_v33, %v3728_v55  ;;  %v700_v17 = vadd.f32 %v3728_v55, %v699_v44  ;;  %v2553_v26 = vsel %vm2552_vm4, %v3780_v37, %v2551_v15 }
 0x120   : > { %4377 = vst [vmem:[#allocation2_spill] sm:$0xff] %v3900_v50  ;;  %v1957_v31 = vmax.f32 %v1096_v41, %v3193_v61  ;;  %v2051_v59 = vmax.f32 %v1947_v9, %v1955_v5  ;;  %v2052_v16 = vmax.f32 %v1948_v1, %v1956_v54  ;;  %v715_v7 = vadd.f32 %v3396_v23, %v3728_v55 }
 0x121   : > { %v2391_v40 = vrot.slane %v2050_v19, %v3736_v3  ;;  %v795_v56 = vmax.f32 %v705_v45, 0.0  ;;  %v794_v48 = vmax.f32 %v700_v17, 0.0  ;;  %v2555_v39 = vsel %vm2554_vm5, %v3767_v62, %v2553_v26 }
 0x122   : > { %v2053_v34 = vmax.f32 %v1949_v14, %v1957_v31  ;;  %v2395_v60 = vrot.slane %v2051_v59, %v3736_v3  ;;  %v3914_v30 = vrot.slane %v2052_v16, %v3736_v3  ;;  %v2557_v1 = vsel %vm2556_vm6, %v2315_v43, %v2555_v39 }
 0x123   : > { %v1131_v33 = vcombine.high %v795_v56, %v795_v56  ;;  %v1138_v9 = vrot.slane %v795_v56, %v3731_v58  ;;  %v1114_v44 = vcombine.high %v794_v48, %v794_v48  ;;  %v2559_v14 = vsel %vm2558_vm7, %v2319_v63, %v2557_v1 }
 0x124   : > { %v3921_v37 = vrot.slane %v2053_v34, %v3736_v3  ;;  %v3924_v41 = vsel %vm2548_vm2, %v2395_v60, %v2391_v40  ;;  %v1121_v4 = vrot.slane %v794_v48, %v3731_v58  ;;  %v2561_v52 = vsel %vm2560_vm8, %v2323_v11, %v2559_v14  ;;  %v709_v11 = vpop.f32.mrf.mxu0  ;;  %v759_v14 = vpop.f32.mrf.mxu1 }
 0x125   : > { %v1145_v62 = vrot.slane %v1131_v33, %v3731_v58  ;;  %v1146_v21 = vcombine.high %v1138_v9, %v1138_v9  ;;  %v3202_v43 = vrot.slane %v1138_v9, 9  ;;  %3443 = vmatprep.mubr.msk.f32.mxu1 %vm2098_vm1, %v2561_v52  ;;  %v1128_v61 = vrot.slane %v1114_v44, %v3731_v58 }
 0x126   : > { %4378 = vst [vmem:[#allocation3_spill] sm:$0xff] %v3921_v37  ;;  %v1129_v5 = vcombine.high %v1121_v4, %v1121_v4  ;;  %v3198_v54 = vrot.slane %v1121_v4, 9  ;;  %v797_v19 = vmax.f32 %v715_v7, 0.0  ;;  %v710_v44 = vadd.f32 %v3728_v55, %v709_v11 }
 0x127   : > { %v1147_v23 = vcombine.high %v1145_v62, %v1145_v62  ;;  %v3203_v15 = vrot.slane %v1146_v21, 9  ;;  %v3204_v45 = vrot.slane %v1145_v62, 9  ;;  %v1966_v17 = vmax.f32 %v1138_v9, %v3202_v43 }
 0x128   : > { %v1130_v63 = vcombine.high %v1128_v61, %v1128_v61  ;;  %v3199_v31 = vrot.slane %v1129_v5, 9  ;;  %v3200_v59 = vrot.slane %v1128_v61, 9  ;;  %v3932_v16 = vmax.f32 %v1121_v4, %v3198_v54 }
 0x129   : > { %v3205_v40 = vrot.slane %v1147_v23, 9  ;;  %v3934_v26 = vmax.f32 %v1146_v21, %v3203_v15  ;;  %v3936_v56 = vmax.f32 %v1145_v62, %v3204_v45  ;;  %v1165_v48 = vcombine.high %v797_v19, %v797_v19 }
 0x12a   : > { %v3201_v34 = vrot.slane %v1130_v63, 9  ;;  %v3938_v60 = vmax.f32 %v1129_v5, %v3199_v31  ;;  %v3940_v7 = vmax.f32 %v1128_v61, %v3200_v59  ;;  %v1172_v39 = vrot.slane %v797_v19, %v3731_v58 }
 0x12b   : > { %4379 = vst [vmem:[#allocation4_spill] sm:$0xff] %v3934_v26  ;;  %4380 = vst [vmem:[#allocation5_spill] sm:$0xff] %v3936_v56  ;;  %v3943_v1 = vmax.f32 %v1147_v23, %v3205_v40  ;;  %v1179_v33 = vrot.slane %v1165_v48, %v3731_v58  ;;  %v807_v9 = vmax.f32 %v3742_v13, 0.0  ;;  %v760_v21 = vadd.f32 %v3728_v55, %v759_v14  ;;  %v3399_v14 = vpop.f32.mrf.mxu0 }
 0x12c   : > { %v3948_v4 = vmax.f32 %v1130_v63, %v3201_v34  ;;  %v1180_v52 = vcombine.high %v1172_v39, %v1172_v39  ;;  %v3210_v62 = vrot.slane %v1172_v39, 9  ;;  %v796_v15 = vmax.f32 %v710_v44, 0.0 }
 0x12d   : > { %v1181_v43 = vcombine.high %v1179_v33, %v1179_v33  ;;  %v3212_v61 = vrot.slane %v1179_v33, 9  ;;  %v1335_v5 = vcombine.high %v807_v9, %v807_v9  ;;  %v1342_v54 = vrot.slane %v807_v9, %v3731_v58 }
 0x12e   : > { %v3211_v19 = vrot.slane %v1180_v52, 9  ;;  %v1974_v23 = vmax.f32 %v1172_v39, %v3210_v62  ;;  %v806_v45 = vmax.f32 %v760_v21, 0.0  ;;  %v1148_v34 = vcombine.high %v796_v15, %v796_v15 }
 0x12f   : > { %v3213_v31 = vrot.slane %v1181_v43, 9  ;;  %v3952_v13 = vmax.f32 %v1179_v33, %v3212_v61  ;;  %v1349_v59 = vrot.slane %v1335_v5, %v3731_v58  ;;  %v1350_v63 = vcombine.high %v1342_v54, %v1342_v54  ;;  %v719_v33 = vpop.f32.mrf.mxu0 }
 0x130   : > { %v3955_v11 = vmax.f32 %v1180_v52, %v3211_v19  ;;  %v2062_v40 = vmax.f32 %v1966_v17, %v1974_v23  ;;  %v3250_v48 = vrot.slane %v1342_v54, 9  ;;  %v1162_v5 = vrot.slane %v1148_v34, %v3731_v58 }
 0x131   : > { %4381 = vst [vmem:[#allocation6_spill] sm:$0xff] %v3952_v13  ;;  %v3957_v25 = vmax.f32 %v1181_v43, %v3213_v31  ;;  %v1351_v39 = vcombine.high %v1349_v59, %v1349_v59  ;;  %v3251_v44 = vrot.slane %v1350_v63, 9  ;;  %v3252_v21 = vrot.slane %v1349_v59, 9 }
 0x132   : > { %4382 = vst [vmem:[#allocation7_spill] sm:$0xff] %v3955_v11  ;;  %v3964_v62 = vrot.slane %v2062_v40, %v3736_v3  ;;  %v3966_v52 = vmax.f32 %v1342_v54, %v3250_v48  ;;  %v1155_v43 = vrot.slane %v796_v15, %v3731_v58  ;;  %v1318_v23 = vcombine.high %v806_v45, %v806_v45 }
 0x133   : > { %v3253_v17 = vrot.slane %v1351_v39, 9  ;;  %v3968_v61 = vmax.f32 %v1350_v63, %v3251_v44  ;;  %v3972_v19 = vmax.f32 %v1349_v59, %v3252_v21  ;;  %v1325_v31 = vrot.slane %v806_v45, %v3731_v58 }
 0x134   : > { %4383 = vst [vmem:[#allocation8_spill] sm:$0xff] %v3964_v62  ;;  %v4386_v40 = vmax.f32 %v3786_v42, %v3794_v29  ;;  %v1163_v48 = vcombine.high %v1155_v43, %v1155_v43  ;;  %v1164_v63 = vcombine.high %v1162_v5, %v1162_v5  ;;  %v3206_v44 = vrot.slane %v1155_v43, 9  ;;  %v3414_v42 = vpop.f32.mrf.mxu1 }
 0x135   : > { %4384 = vst [vmem:[#allocation9_spill] sm:$0xff] %v3968_v61  ;;  %4385 = vst [vmem:[#allocation10_spill] sm:$0xff] %v3972_v19  ;;  %v3979_v54 = vmax.f32 %v1351_v39, %v3253_v17  ;;  %v3208_v2 = vrot.slane %v1162_v5, 9  ;;  %v1332_v15 = vrot.slane %v1318_v23, %v3731_v58  ;;  %v1333_v34 = vcombine.high %v1325_v31, %v1325_v31 }
 0x136   : > { %v2355_v9 = vrot.slane %v4386_v40, %v3736_v3  ;;  %v3246_v59 = vrot.slane %v1325_v31, 9  ;;  %v3207_v21 = vrot.slane %v1163_v48, 9  ;;  %v3209_v62 = vrot.slane %v1164_v63, 9 }
 0x137   : > { %4387 = vst [vmem:[#allocation11_spill] sm:$0xff] %v3979_v54  ;;  %v1970_v50 = vmax.f32 %v1155_v43, %v3206_v44  ;;  %v2564_v45 = vsel %vm2552_vm4, %v3815_v10, %v3819_v8  ;;  %v1972_v29 = vmax.f32 %v1162_v5, %v3208_v2  ;;  %v1334_v40 = vcombine.high %v1332_v15, %v1332_v15  ;;  %v3402_v54 = vpop.f32.mrf.mxu0  ;;  %v769_v5 = vpop.f32.mrf.mxu1 }
 0x138   : > { %v3247_v39 = vrot.slane %v1333_v34, 9  ;;  %v3248_v17 = vrot.slane %v1332_v15, 9  ;;  %v1971_v13 = vmax.f32 %v1163_v48, %v3207_v21  ;;  %v1973_v56 = vmax.f32 %v1164_v63, %v3209_v62 }
 0x139   : > { %v2058_v11 = vmax.f32 %v3932_v16, %v1970_v50  ;;  %v3986_v23 = vmax.f32 %v1325_v31, %v3246_v59  ;;  %v2060_v26 = vmax.f32 %v3940_v7, %v1972_v29  ;;  %v3249_v37 = vrot.slane %v1334_v40, 9  ;;  %v729_v48 = vpop.f32.mrf.mxu0 }
 0x13a   : > { %v3989_v43 = vmax.f32 %v1333_v34, %v3247_v39  ;;  %v3991_v44 = vmax.f32 %v1332_v15, %v3248_v17  ;;  %v2059_v10 = vmax.f32 %v3938_v60, %v1971_v13  ;;  %v2061_v8 = vmax.f32 %v3948_v4, %v1973_v56 }
 0x13b   : > { %v2423_v2 = vrot.slane %v2058_v11, %v3736_v3  ;;  %v2565_v62 = vsel %vm2554_vm5, %v3797_v36, %v2564_v45  ;;  %v3999_v50 = vrot.slane %v2060_v26, %v3736_v3  ;;  %v4001_v16 = vmax.f32 %v1334_v40, %v3249_v37 }
 0x13c   : > { %v2566_v7 = vsel %vm2556_vm6, %v3802_v27, %v2565_v62  ;;  %v725_v31 = vadd.f32 %v3399_v14, %v3728_v55  ;;  %v2427_v60 = vrot.slane %v2059_v10, %v3736_v3  ;;  %v4008_v56 = vrot.slane %v2061_v8, %v3736_v3 }
 0x13d   : > { %v2567_v36 = vsel %vm2558_vm7, %v3805_v46, %v2566_v7  ;;  %v775_v4 = vadd.f32 %v3414_v42, %v3728_v55  ;;  %v720_v13 = vadd.f32 %v3728_v55, %v719_v33  ;;  %v770_v27 = vadd.f32 %v3728_v55, %v769_v5 }
 0x13e   : > { %4388 = vst [vmem:[#allocation12_spill] sm:$0xff] %v4008_v56  ;;  %v2568_v26 = vsel %vm2560_vm8, %v2355_v9, %v2567_v36  ;;  %v799_v37 = vmax.f32 %v725_v31, 0.0  ;;  %v4017_v11 = vsel %vm2548_vm2, %v2427_v60, %v2423_v2  ;;  %v735_v63 = vadd.f32 %v3402_v54, %v3728_v55 }
 0x13f   : > { %3444 = vmatmul.mubr.msk.f32.vlgmr.msra.gmra.mxu1 %vm2098_vm1, %v2568_v26  ;;  %v809_v14 = vmax.f32 %v775_v4, 0.0  ;;  %v730_v15 = vadd.f32 %v3728_v55, %v729_v48  ;;  %v798_v59 = vmax.f32 %v720_v13, 0.0  ;;  %v808_v9 = vmax.f32 %v770_v27, 0.0 }
 0x140   : > { %v1199_v46 = vcombine.high %v799_v37, %v799_v37  ;;  %v1206_v34 = vrot.slane %v799_v37, %v3731_v58  ;;  %v801_v45 = vmax.f32 %v735_v63, 0.0 }
 0x141   : > { %v1369_v21 = vcombine.high %v809_v14, %v809_v14  ;;  %v1376_v33 = vrot.slane %v809_v14, %v3731_v58  ;;  %v800_v42 = vmax.f32 %v730_v15, 0.0  ;;  %v1182_v17 = vcombine.high %v798_v59, %v798_v59 }
 0x142   : > { %v1213_v29 = vrot.slane %v1199_v46, %v3731_v58  ;;  %v1214_v40 = vcombine.high %v1206_v34, %v1206_v34  ;;  %v3218_v39 = vrot.slane %v1206_v34, 9  ;;  %v1189_v55 = vrot.slane %v798_v59, %v3731_v58 }
 0x143   : > { %v1383_v10 = vrot.slane %v1369_v21, %v3731_v58  ;;  %v1384_v54 = vcombine.high %v1376_v33, %v1376_v33  ;;  %v3258_v8 = vrot.slane %v1376_v33, 9  ;;  %v1196_v13 = vrot.slane %v1182_v17, %v3731_v58 }
 0x144   : > { %v1215_v2 = vcombine.high %v1213_v29, %v1213_v29  ;;  %v3219_v62 = vrot.slane %v1214_v40, 9  ;;  %v3220_v5 = vrot.slane %v1213_v29, 9  ;;  %v4027_v7 = vmax.f32 %v1206_v34, %v3218_v39 }
 0x145   : > { %v1385_v31 = vcombine.high %v1383_v10, %v1383_v10  ;;  %v3259_v48 = vrot.slane %v1384_v54, 9  ;;  %v3260_v60 = vrot.slane %v1383_v10, 9  ;;  %v2022_v36 = vmax.f32 %v1376_v33, %v3258_v8 }
 0x146   : > { %v3221_v4 = vrot.slane %v1215_v2, 9  ;;  %v4029_v26 = vmax.f32 %v1214_v40, %v3219_v62  ;;  %v4031_v37 = vmax.f32 %v1213_v29, %v3220_v5  ;;  %v1197_v34 = vcombine.high %v1189_v55, %v1189_v55 }
 0x147   : > { %v3261_v27 = vrot.slane %v1385_v31, 9  ;;  %v4034_v14 = vmax.f32 %v1384_v54, %v3259_v48  ;;  %v4036_v63 = vmax.f32 %v1383_v10, %v3260_v60  ;;  %v2086_v15 = vmax.f32 %v3966_v52, %v2022_v36 }
 0x148   : > { %v4039_v46 = vmax.f32 %v1215_v2, %v3221_v4  ;;  %v1198_v59 = vcombine.high %v1196_v13, %v1196_v13  ;;  %v3214_v21 = vrot.slane %v1189_v55, 9  ;;  %v3215_v17 = vrot.slane %v1197_v34, 9 }
 0x149   : > { %4389 = vst [vmem:[#allocation13_spill] sm:$0xff] %v4034_v14  ;;  %4390 = vst [vmem:[#allocation14_spill] sm:$0xff] %v4036_v63  ;;  %v4041_v33 = vmax.f32 %v1385_v31, %v3261_v27  ;;  %v4048_v39 = vrot.slane %v2086_v15, %v3736_v3  ;;  %v3216_v10 = vrot.slane %v1196_v13, 9  ;;  %v1352_v8 = vcombine.high %v808_v9, %v808_v9 }
 0x14a   : > { %v3217_v54 = vrot.slane %v1198_v59, 9  ;;  %v4050_v52 = vmax.f32 %v1189_v55, %v3214_v21  ;;  %v1359_v2 = vrot.slane %v808_v9, %v3731_v58  ;;  %v1233_v62 = vcombine.high %v801_v45, %v801_v45 }
 0x14b   : > { %4391 = vst [vmem:[#allocation15_spill] sm:$0xff] %v4041_v33  ;;  %4392 = vst [vmem:[#allocation16_spill] sm:$0xff] %v4048_v39  ;;  %v1240_v5 = vrot.slane %v801_v45, %v3731_v58  ;;  %v4054_v31 = vmax.f32 %v1197_v34, %v3215_v17  ;;  %v4056_v48 = vmax.f32 %v1196_v13, %v3216_v10 }
 0x14c   : > { %v4058_v60 = vmax.f32 %v1198_v59, %v3217_v54  ;;  %v1216_v36 = vcombine.high %v800_v42, %v800_v42  ;;  %v1366_v4 = vrot.slane %v1352_v8, %v3731_v58  ;;  %v1367_v27 = vcombine.high %v1359_v2, %v1359_v2 }
 0x14d   : > { %v3254_v15 = vrot.slane %v1359_v2, 9  ;;  %v1247_v55 = vrot.slane %v1233_v62, %v3731_v58  ;;  %v1248_v21 = vcombine.high %v1240_v5, %v1240_v5  ;;  %v3226_v40 = vrot.slane %v1240_v5, 9  ;;  %v3405_v62 = vpop.f32.mrf.mxu0 }
 0x14e   : > { %v1223_v9 = vrot.slane %v800_v42, %v3731_v58  ;;  %v1230_v29 = vrot.slane %v1216_v36, %v3731_v58  ;;  %v1368_v45 = vcombine.high %v1366_v4, %v1366_v4  ;;  %v3255_v34 = vrot.slane %v1367_v27, 9 }
 0x14f   : > { %v3256_v17 = vrot.slane %v1366_v4, 9  ;;  %v2018_v13 = vmax.f32 %v1359_v2, %v3254_v15  ;;  %v1249_v10 = vcombine.high %v1247_v55, %v1247_v55  ;;  %v3227_v59 = vrot.slane %v1248_v21, 9 }
 0x150   : > { %v3228_v54 = vrot.slane %v1247_v55, 9  ;;  %v1990_v39 = vmax.f32 %v1240_v5, %v3226_v40  ;;  %v3257_v63 = vrot.slane %v1368_v45, 9  ;;  %v2019_v8 = vmax.f32 %v1367_v27, %v3255_v34 }
 0x151   : > { %v2020_v19 = vmax.f32 %v1366_v4, %v3256_v17  ;;  %v2082_v14 = vmax.f32 %v3986_v23, %v2018_v13  ;;  %v3229_v61 = vrot.slane %v1249_v10, 9  ;;  %v4065_v33 = vmax.f32 %v1248_v21, %v3227_v59 }
 0x152   : > { %v4067_v42 = vmax.f32 %v1247_v55, %v3228_v54  ;;  %v2070_v36 = vmax.f32 %v4027_v7, %v1990_v39  ;;  %v2021_v56 = vmax.f32 %v1368_v45, %v3257_v63  ;;  %v2083_v2 = vmax.f32 %v3989_v43, %v2019_v8 }
 0x153   : > { %v2084_v15 = vmax.f32 %v3991_v44, %v2020_v19  ;;  %v2519_v40 = vrot.slane %v2082_v14, %v3736_v3  ;;  %v4073_v5 = vmax.f32 %v1249_v10, %v3229_v61  ;;  %v2071_v23 = vmax.f32 %v4029_v26, %v4065_v33  ;;  %v739_v44 = vpop.f32.mrf.mxu0 }
 0x154   : > { %v2072_v4 = vmax.f32 %v4031_v37, %v4067_v42  ;;  %v4080_v27 = vrot.slane %v2070_v36, %v3736_v3  ;;  %v2085_v7 = vmax.f32 %v4001_v16, %v2021_v56  ;;  %v2523_v63 = vrot.slane %v2083_v2, %v3736_v3 }
 0x155   : > { %v4085_v43 = vrot.slane %v2084_v15, %v3736_v3  ;;  %v1231_v19 = vcombine.high %v1223_v9, %v1223_v9  ;;  %v1232_v61 = vcombine.high %v1230_v29, %v1230_v29  ;;  %v3222_v14 = vrot.slane %v1223_v9, 9  ;;  %v3408_v36 = vpop.f32.mrf.mxu0 }
 0x156   : > { %v3224_v39 = vrot.slane %v1230_v29, 9  ;;  %v2049_v55 = vmax.f32 %v3829_v32, %v3837_v57  ;;  %v4090_v21 = vrot.slane %v2085_v7, %v3736_v3  ;;  %v4093_v45 = vsel %vm2548_vm2, %v2523_v63, %v2519_v40 }
 0x157   : > { %v3223_v16 = vrot.slane %v1231_v19, 9  ;;  %v4393_v56 = vmax.f32 %v3824_v22, %v3834_v0  ;;  %v3225_v17 = vrot.slane %v1232_v61, 9  ;;  %v1986_v13 = vmax.f32 %v1223_v9, %v3222_v14  ;;  %v3510_v22 = vld [vmem:[%s4360_s3] ss:$0 sm:$0xff] }
 0x158   : > { %v1988_v10 = vmax.f32 %v1230_v29, %v3224_v39  ;;  %v4394_v59 = vmax.f32 %v3821_v18, %v3832_v6  ;;  %v2387_v54 = vrot.slane %v2049_v55, %v3736_v3  ;;  %v2570_v8 = vsel %vm2550_vm3, %v3863_v53, %v3872_v51 }
 0x159   : > { %v2379_v34 = vrot.slane %v4393_v56, %v3736_v3  ;;  %v1987_v57 = vmax.f32 %v1231_v19, %v3223_v16  ;;  %v745_v0 = vadd.f32 %v3510_v22, %v3405_v62  ;;  %v1989_v9 = vmax.f32 %v1232_v61, %v3225_v17  ;;  %v749_v19 = vpop.f32.mrf.mxu0 }
 0x15a   : > { %v2383_v32 = vrot.slane %v4394_v59, %v3736_v3  ;;  %v2066_v29 = vmax.f32 %v4050_v52, %v1986_v13  ;;  %v2068_v2 = vmax.f32 %v4056_v48, %v1988_v10  ;;  %v2571_v18 = vsel %vm2552_vm4, %v3869_v35, %v2570_v8 }
 0x15b   : > { %v2067_v6 = vmax.f32 %v4054_v31, %v1987_v57  ;;  %v2572_v15 = vsel %vm2554_vm5, %v3845_v20, %v2571_v18  ;;  %v803_v53 = vmax.f32 %v745_v0, 0.0  ;;  %v740_v51 = vadd.f32 %v3510_v22, %v739_v44 }
 0x15c   : > { %v2069_v40 = vmax.f32 %v4058_v60, %v1989_v9  ;;  %v2455_v62 = vrot.slane %v2066_v29, %v3736_v3  ;;  %v4120_v7 = vrot.slane %v2068_v2, %v3736_v3  ;;  %v2573_v52 = vsel %vm2556_vm6, %v2379_v34, %v2572_v15 }
 0x15d   : > { %v2459_v48 = vrot.slane %v2067_v6, %v3736_v3  ;;  %v2574_v35 = vsel %vm2558_vm7, %v2383_v32, %v2573_v52  ;;  %v1267_v63 = vcombine.high %v803_v53, %v803_v53  ;;  %v1274_v31 = vrot.slane %v803_v53, %v3731_v58 }
 0x15e   : > { %v4127_v20 = vrot.slane %v2069_v40, %v3736_v3  ;;  %v2575_v60 = vsel %vm2560_vm8, %v2387_v54, %v2574_v35  ;;  %v802_v44 = vmax.f32 %v740_v51, 0.0  ;;  %v755_v61 = vadd.f32 %v3510_v22, %v3408_v36 }
 0x15f   : > { %v4131_v14 = vsel %vm2548_vm2, %v2459_v48, %v2455_v62  ;;  %3446 = vmatprep.mubr.msk.f32.mxu1 %vm2098_vm1, %v2575_v60  ;;  %v1281_v39 = vrot.slane %v1267_v63, %v3731_v58  ;;  %v1282_v55 = vcombine.high %v1274_v31, %v1274_v31  ;;  %v3234_v16 = vrot.slane %v1274_v31, 9 }
 0x160   : > { %v1250_v56 = vcombine.high %v802_v44, %v802_v44  ;;  %v1257_v34 = vrot.slane %v802_v44, %v3731_v58  ;;  %v805_v17 = vmax.f32 %v755_v61, 0.0  ;;  %v750_v13 = vadd.f32 %v3510_v22, %v749_v19 }
 0x161   : > { %v1283_v10 = vcombine.high %v1281_v39, %v1281_v39  ;;  %v3235_v59 = vrot.slane %v1282_v55, 9  ;;  %v3236_v32 = vrot.slane %v1281_v39, 9  ;;  %v1998_v57 = vmax.f32 %v1274_v31, %v3234_v16 }
 0x162   : > { %v1264_v54 = vrot.slane %v1250_v56, %v3731_v58  ;;  %v1265_v8 = vcombine.high %v1257_v34, %v1257_v34  ;;  %v3230_v0 = vrot.slane %v1257_v34, 9  ;;  %v1301_v36 = vcombine.high %v805_v17, %v805_v17 }
 0x163   : > { %v3237_v9 = vrot.slane %v1283_v10, 9  ;;  %v4137_v29 = vmax.f32 %v1282_v55, %v3235_v59  ;;  %v4139_v2 = vmax.f32 %v1281_v39, %v3236_v32  ;;  %v1308_v18 = vrot.slane %v805_v17, %v3731_v58 }
 0x164   : > { %v1266_v6 = vcombine.high %v1264_v54, %v1264_v54  ;;  %v3231_v15 = vrot.slane %v1265_v8, 9  ;;  %v3232_v53 = vrot.slane %v1264_v54, 9  ;;  %v1994_v22 = vmax.f32 %v1257_v34, %v3230_v0 }
 0x165   : > { %v4142_v51 = vmax.f32 %v1283_v10, %v3237_v9  ;;  %v1315_v40 = vrot.slane %v1301_v36, %v3731_v58  ;;  %v1316_v62 = vcombine.high %v1308_v18, %v1308_v18  ;;  %v3242_v52 = vrot.slane %v1308_v18, 9 }
 0x166   : > { %v3233_v48 = vrot.slane %v1266_v6, 9  ;;  %v1995_v35 = vmax.f32 %v1265_v8, %v3231_v15  ;;  %v1996_v63 = vmax.f32 %v1264_v54, %v3232_v53  ;;  %v804_v31 = vmax.f32 %v750_v13, 0.0 }
 0x167   : > { %v1317_v19 = vcombine.high %v1315_v40, %v1315_v40  ;;  %v3243_v60 = vrot.slane %v1316_v62, 9  ;;  %v3244_v44 = vrot.slane %v1315_v40, 9  ;;  %v2006_v61 = vmax.f32 %v1308_v18, %v3242_v52 }
 0x168   : > { %v1997_v39 = vmax.f32 %v1266_v6, %v3233_v48  ;;  %v1284_v55 = vcombine.high %v804_v31, %v804_v31  ;;  %v1291_v16 = vrot.slane %v804_v31, %v3731_v58  ;;  %v2057_v56 = vmax.f32 %v3866_v47, %v3893_v12  ;;  %v4397_v48 = vld [vmem:[#allocation3_spill] sm:$0xff] }
 0x169   : > { %v3245_v34 = vrot.slane %v1317_v19, 9  ;;  %v2007_v17 = vmax.f32 %v1316_v62, %v3243_v60  ;;  %v2008_v10 = vmax.f32 %v1315_v40, %v3244_v44  ;;  %v2078_v59 = vmax.f32 %v1998_v57, %v2006_v61  ;;  %v4401_v44 = vld [vmem:[#allocation5_spill] sm:$0xff]  ;;  %v4402_v61 = vld [vmem:[#allocation6_spill] sm:$0xff] }
 0x16a   : > { %v1298_v32 = vrot.slane %v1284_v55, %v3731_v58  ;;  %v1299_v8 = vcombine.high %v1291_v16, %v1291_v16  ;;  %v3238_v54 = vrot.slane %v1291_v16, 9  ;;  %v4395_v13 = vmax.f32 %v3856_v28, %v3888_v24 }
 0x16b   : > { %v2009_v36 = vmax.f32 %v1317_v19, %v3245_v34  ;;  %v2079_v9 = vmax.f32 %v4137_v29, %v2007_v17  ;;  %v2080_v18 = vmax.f32 %v4139_v2, %v2008_v10  ;;  %v2503_v47 = vrot.slane %v2078_v59, %v3736_v3  ;;  %v4398_v19 = vld [vmem:[#allocation4_spill] sm:$0xff] }
 0x16c   : > { %v2411_v0 = vrot.slane %v4395_v13, %v3736_v3  ;;  %v1300_v12 = vcombine.high %v1298_v32, %v1298_v32  ;;  %v3239_v6 = vrot.slane %v1299_v8, 9  ;;  %v3240_v15 = vrot.slane %v1298_v32, 9  ;;  %v4405_v13 = vld [vmem:[#allocation12_spill] sm:$0xff] }
 0x16d   : > { %v2002_v57 = vmax.f32 %v1291_v16, %v3238_v54  ;;  %v4396_v58 = vmax.f32 %v3858_v38, %v3890_v49  ;;  %v2419_v40 = vrot.slane %v2057_v56, %v3736_v3  ;;  %v2577_v28 = vsel %vm2550_vm3, %v3914_v30, %v3924_v41  ;;  %v4399_v38 = vld [vmem:[#allocation7_spill] sm:$0xff]  ;;  %v4404_v56 = vld [vmem:[#allocation2_spill] sm:$0xff] }
 0x16e   : > { %v2065_v24 = vmax.f32 %v3943_v1, %v3957_v25  ;;  %v3241_v29 = vrot.slane %v1300_v12, 9  ;;  %v2003_v2 = vmax.f32 %v1299_v8, %v3239_v6  ;;  %v2004_v62 = vmax.f32 %v1298_v32, %v3240_v15 }
 0x16f   : > { %v2415_v53 = vrot.slane %v4396_v58, %v3736_v3  ;;  %v2074_v52 = vmax.f32 %v1994_v22, %v2002_v57  ;;  %v2578_v31 = vsel %vm2552_vm4, %v4397_v48, %v2577_v28  ;;  %v4400_v49 = vmax.f32 %v4398_v19, %v4399_v38  ;;  %v4410_v28 = vld [vmem:[#allocation13_spill] sm:$0xff] }
 0x170   : > { %v4403_v55 = vmax.f32 %v4401_v44, %v4402_v61  ;;  %v2451_v41 = vrot.slane %v2065_v24, %v3736_v3  ;;  %v2005_v25 = vmax.f32 %v1300_v12, %v3241_v29  ;;  %v2075_v1 = vmax.f32 %v1995_v35, %v2003_v2  ;;  %v4415_v61 = vld [vmem:[#allocation16_spill] sm:$0xff] }
 0x171   : > { %v2443_v60 = vrot.slane %v4400_v49, %v3736_v3  ;;  %v2076_v16 = vmax.f32 %v1996_v63, %v2004_v62  ;;  %v2487_v22 = vrot.slane %v2074_v52, %v3736_v3  ;;  %v2579_v34 = vsel %vm2554_vm5, %v4404_v56, %v2578_v31  ;;  %v4412_v62 = vld [vmem:[#allocation10_spill] sm:$0xff] }
 0x172   : > { %v2447_v30 = vrot.slane %v4403_v55, %v3736_v3  ;;  %v2584_v17 = vsel %vm2550_vm3, %v3999_v50, %v4017_v11  ;;  %v2073_v10 = vmax.f32 %v4039_v46, %v4073_v5  ;;  %v2475_v59 = vrot.slane %v2071_v23, %v3736_v3  ;;  %v4406_v23 = vld [vmem:[#allocation8_spill] sm:$0xff]  ;;  %v4413_v52 = vld [vmem:[#allocation14_spill] sm:$0xff] }
 0x173   : > { %v2077_v32 = vmax.f32 %v1997_v39, %v2005_v25  ;;  %v2491_v35 = vrot.slane %v2075_v1, %v3736_v3  ;;  %v2495_v63 = vrot.slane %v2076_v16, %v3736_v3  ;;  %v2580_v8 = vsel %vm2556_vm6, %v2411_v0, %v2579_v34 }
 0x174   : > { %v2581_v54 = vsel %vm2558_vm7, %v2415_v53, %v2580_v8  ;;  %v2585_v50 = vsel %vm2552_vm4, %v4405_v13, %v2584_v17  ;;  %v2479_v11 = vrot.slane %v2072_v4, %v3736_v3  ;;  %v2483_v26 = vrot.slane %v2073_v10, %v3736_v3 }
 0x175   : > { %v2499_v46 = vrot.slane %v2077_v32, %v3736_v3  ;;  %v2597_v33 = vsel %vm2548_vm2, %v2491_v35, %v2487_v22  ;;  %v2582_v5 = vsel %vm2560_vm8, %v2419_v40, %v2581_v54  ;;  %v2586_v39 = vsel %vm2554_vm5, %v4406_v23, %v2585_v50  ;;  %v4409_v40 = vld [vmem:[#allocation9_spill] sm:$0xff] }
 0x176   : > { %3447 = vmatmul.mubr.msk.f32.gmra.mxu1 %vm2098_vm1, %v2582_v5  ;;  %v2587_v0 = vsel %vm2556_vm6, %v2443_v60, %v2586_v39  ;;  %v2591_v37 = vsel %vm2550_vm3, %v4120_v7, %v4131_v14  ;;  %v2081_v42 = vmax.f32 %v4142_v51, %v2009_v36  ;;  %v2507_v4 = vrot.slane %v2079_v9, %v3736_v3  ;;  %v4408_v9 = vld [vmem:[#allocation11_spill] sm:$0xff] }
 0x177   : > { %v2588_v12 = vsel %vm2558_vm7, %v2447_v30, %v2587_v0  ;;  %v2592_v6 = vsel %vm2552_vm4, %v4127_v20, %v2591_v37  ;;  %v2511_v15 = vrot.slane %v2080_v18, %v3736_v3  ;;  %v2598_v57 = vsel %vm2550_vm3, %v2495_v63, %v2597_v33  ;;  %v4407_v20 = vld [vmem:[#allocation15_spill] sm:$0xff] }
 0x178   : > { %v2589_v58 = vsel %vm2560_vm8, %v2451_v41, %v2588_v12  ;;  %v2593_v53 = vsel %vm2554_vm5, %v4080_v27, %v2592_v6  ;;  %v2515_v7 = vrot.slane %v2081_v42, %v3736_v3  ;;  %v2599_v14 = vsel %vm2552_vm4, %v2499_v46, %v2598_v57 }
 0x179   : > { %3449 = vmatprep.mubr.msk.f32.mxu1 %vm2098_vm1, %v2589_v58  ;;  %v2594_v51 = vsel %vm2556_vm6, %v2475_v59, %v2593_v53  ;;  %v2600_v36 = vsel %vm2554_vm5, %v2503_v47, %v2599_v14  ;;  %v2089_v18 = vmax.f32 %v4408_v9, %v4407_v20  ;;  %v4411_v24 = vmax.f32 %v4409_v40, %v4410_v28  ;;  %v2833_v40 = vld [vmem:[%s4364_s7 + $0x18] sm:$0xff] }
 0x17a   : > { %v2595_v27 = vsel %vm2558_vm7, %v2479_v11, %v2594_v51  ;;  %v2601_v2 = vsel %vm2556_vm6, %v2507_v4, %v2600_v36  ;;  %v4414_v48 = vmax.f32 %v4412_v62, %v4413_v52  ;;  %v2605_v47 = vsel %vm2550_vm3, %v4085_v43, %v4093_v45  ;;  %v3278_v11 = vld [vmem:[%s4363_s6] ss:$0 sm:$0xff] }
 0x17b   : > { %v2539_v29 = vrot.slane %v4411_v24, %v3736_v3  ;;  %v2596_v19 = vsel %vm2560_vm8, %v2483_v26, %v2595_v27  ;;  %v2602_v38 = vsel %vm2558_vm7, %v2511_v15, %v2601_v2  ;;  %v2547_v49 = vrot.slane %v2089_v18, %v3736_v3  ;;  %v2832_v24 = vld [vmem:[%s4364_s7 + $0x10] sm:$0xff]  ;;  %v2830_v27 = vld [vmem:[%s4364_s7] sm:$0xff] }
 0x17c   : > { %v2543_v31 = vrot.slane %v4414_v48, %v3736_v3  ;;  %v2606_v60 = vsel %vm2552_vm4, %v4090_v21, %v2605_v47  ;;  %3450 = vmatmul.mubr.msk.f32.gmra.mxu1 %vm2098_vm1, %v2596_v19  ;;  %v2603_v44 = vsel %vm2560_vm8, %v2515_v7, %v2602_v38  ;;  %v3528_v41 = vmov 0.0   ;;  %v3425_v21 = vpop.f32.mrf.mxu1  ;;  %v2909_v48 = vld [vmem:[%s4366_s9] sm:$0x3] }
 0x17d   : > { %v2607_v55 = vsel %vm2554_vm5, %v4415_v61, %v2606_v60  ;;  %3452 = vmatprep.mubr.msk.f32.mxu1 %vm2098_vm1, %v2603_v44  ;;  %3455 = vmatprep.subr.mxu1 %v3528_v41  ;;  %v3530_v28 = vmov 1.0   ;;  %v2910_v60 = vld [vmem:[%s4367_s10] sm:$0x1] }
 0x17e   : > { %v2608_v43 = vsel %vm2556_vm6, %v2539_v29, %v2607_v55  ;;  %v2189_v25 = vpop.f32.mrf.mxu1  ;;  %v2831_v29 = vld [vmem:[%s4364_s7 + $0x8] sm:$0xff] }
 0x17f   : > { %v2609_v45 = vsel %vm2558_vm7, %v2543_v31, %v2608_v43  ;;  %v2834_v31 = vld [vmem:[%s4365_s8] sm:$0x1] }
 0x180   : > { %v2610_v30 = vsel %vm2560_vm8, %v2547_v49, %v2609_v45  ;;  %v3428_v1 = vpop.f32.mrf.mxu1 }
 0x181   : > { %3453 = vmatmul.mubr.msk.f32.gmra.mxu1 %vm2098_vm1, %v2610_v30 }
 0x182   : > { %3471 = vmatprep.mubr.msk.f32.mxu1 %vm3529_vm9, %v3528_v41  ;;  %v2199_v16 = vpop.f32.mrf.mxu1 }
 0x184   : > { %v3431_v22 = vpop.f32.mrf.mxu1 }
 0x186   : > { %v2209_v56 = vpop.f32.mrf.mxu1 }
 0x188   : > { %v3434_v34 = vpop.f32.mrf.mxu1 }
 0x18a   : > { %v2219_v17 = vpop.f32.mrf.mxu1 }
 0x1ff   : > { %v3445_v10 = vpop.f32.mrf.mxu1 }
 0x200   : > { %v2699_v6 = vadd.f32 %v3445_v10, %v3425_v21  ;;  %v3511_v10 = vld [vmem:[%s3695_s21] sm:$0xff] }
 0x201   : > { %v2693_v59 = vpop.f32.mrf.mxu1 }
 0x202   : > { %v2694_v58 = vadd.f32 %v2693_v59, %v2189_v25  ;;  %v2740_v14 = vadd.f32 %v3278_v11, %v2699_v6 }
 0x204   : > { %v2739_v36 = vadd.f32 %v3278_v11, %v2694_v58  ;;  %v2748_v9 = vmax.f32 %v2740_v14, 0.0 }
 0x206   : > { %v2747_v18 = vmax.f32 %v2739_v36, 0.0 }
 0x236   : > { %v3448_v32 = vpop.f32.mrf.mxu1 }
 0x237   : > { %v2709_v23 = vadd.f32 %v3448_v32, %v3428_v1  ;;  %v3512_v32 = vld [vmem:[%s3695_s21 + $0x8] sm:$0xff] }
 0x238   : > { %v2703_v35 = vpop.f32.mrf.mxu1 }
 0x239   : > { %v2704_v42 = vadd.f32 %v2703_v35, %v2199_v16  ;;  %v4273_v15 = vadd.f32 %v3278_v11, %v2709_v23 }
 0x23b   : > { %v4279_v53 = vadd.f32 %v3278_v11, %v2704_v42  ;;  %v2750_v51 = vmax.f32 %v4273_v15, 0.0 }
 0x23c   : > { %v3451_v63 = vpop.f32.mrf.mxu1 }
 0x23d   : > { %v2719_v13 = vadd.f32 %v3451_v63, %v3431_v22  ;;  %v2749_v20 = vmax.f32 %v4279_v53, 0.0  ;;  %v3513_v63 = vld [vmem:[%s3695_s21 + $0x10] sm:$0xff] }
 0x23e   : > { %v2713_v8 = vpop.f32.mrf.mxu1 }
 0x23f   : > { %v2714_v46 = vadd.f32 %v2713_v8, %v2209_v56  ;;  %v4262_v39 = vadd.f32 %v3278_v11, %v2719_v13 }
 0x241   : > { %v3454_v54 = vpop.f32.mrf.mxu1  ;;  %v4267_v4 = vadd.f32 %v3278_v11, %v2714_v46  ;;  %v2752_v57 = vmax.f32 %v4262_v39, 0.0  ;;  %v3518_v39 = vld [vmem:[%s3695_s21 + $0x38] sm:$0xff] }
 0x242   : > { %v2729_v50 = vadd.f32 %v3454_v54, %v3434_v34  ;;  %v3514_v54 = vld [vmem:[%s3695_s21 + $0x18] sm:$0xff] }
 0x243   : > { %v2723_v26 = vpop.f32.mrf.mxu1  ;;  %v2751_v7 = vmax.f32 %v4267_v4, 0.0 }
 0x244   : > { %v4260_v33 = vadd.f32 %v3278_v11, %v2729_v50  ;;  %v2724_v5 = vadd.f32 %v2723_v26, %v2219_v17  ;;  %v3515_v50 = vld [vmem:[%s3695_s21 + $0x20] sm:$0xff]  ;;  %v3516_v26 = vld [vmem:[%s3695_s21 + $0x28] sm:$0xff] }
 0x246   : > { %v2754_v0 = vmax.f32 %v4260_v33, 0.0  ;;  %v4265_v37 = vadd.f32 %v3278_v11, %v2724_v5  ;;  %v3517_v5 = vld [vmem:[%s3695_s21 + $0x30] sm:$0xff] }
 0x248   : > { %v2753_v12 = vmax.f32 %v4265_v37, 0.0  ;;  %3456 = vmatpush3.msra.mxu1 %v2754_v0 }
 0x249   : > { %3457 = vmatprep.subr.mxu1 %v3528_v41 }
 0x24a   : > { %3458 = vmatpush3.msra.mxu1 %v2753_v12 }
 0x24b   : > { %3459 = vmatprep.subr.mxu1 %v3528_v41 }
 0x24c   : > { %3460 = vmatpush3.msra.mxu1 %v2752_v57 }
 0x24d   : > { %3461 = vmatprep.subr.mxu1 %v3528_v41 }
 0x24e   : > { %3462 = vmatpush3.msra.mxu1 %v2751_v7 }
 0x24f   : > { %3463 = vmatprep.subr.mxu1 %v3528_v41 }
 0x250   : > { %3464 = vmatpush3.msra.mxu1 %v2750_v51 }
 0x251   : > { %3465 = vmatprep.subr.mxu1 %v3528_v41 }
 0x252   : > { %3466 = vmatpush3.msra.mxu1 %v2749_v20 }
 0x253   : > { %3467 = vmatprep.subr.mxu1 %v3528_v41 }
 0x254   : > { %3468 = vmatpush3.msra.mxu1 %v2748_v9 }
 0x255   : > { %3469 = vmatprep.subr.mxu1 %v3528_v41 }
 0x256   : > { %3470 = vmatpush3.msra.mxu1 %v2747_v18 }
 0x257   : > { %3472 = vmatmul.mubr.msk.f32.vlgmr.msra.gmra.mxu1 %vm2755_vm10, %v3530_v28  ;;  %3474 = vmatprep.subr.mxu1 %v3528_v41 }
 0x258   : > { %3475 = vmatpush3.msra.mxu1 %v2833_v40  ;;  %3482 = vmatprep.mubr.msk.f32.mxu1 %vm3529_vm9, %v3528_v41 }
 0x259   : > { %3476 = vmatprep.subr.mxu1 %v3528_v41 }
 0x25a   : > { %3477 = vmatpush3.msra.mxu1 %v2832_v24 }
 0x25b   : > { %3478 = vmatprep.subr.mxu1 %v3528_v41 }
 0x25c   : > { %3479 = vmatpush3.msra.mxu1 %v2831_v29 }
 0x25d   : > { %3480 = vmatprep.subr.mxu1 %v3528_v41 }
 0x25e   : > { %3481 = vmatpush3.msra.mxu1 %v2830_v27 }
 0x25f   : > { %3485 = vmatprep.subr.mxu1 %v3528_v41 }
 0x317   : > { %v2825_v2 = vpop.f32.mrf.mxu1 }
 0x318   : > { %v2829_v62 = vmul.f32 0.015625, %v2825_v2 }
 0x319   : > { %v3473_v52 = vpop.f32.mrf.mxu1 }
 0x31a   : > { %3483 = vmatmul.mubr.msk.f32.vlgmr.msra.gmra.mxu1 %vm2098_vm1, %v2829_v62 }
 0x31b   : > { %3487 = vmatprep.mubr.msk.f32.mxu1 %vm3529_vm9, %v3528_v41  ;;  %3486 = vmatpush3.msk.msra.mxu1 %vm2915_vm11, %v2909_v48 }
 0x3da   : > { %v2904_v47 = vpop.f32.mrf.mxu1 }
 0x3db   : > { %v2905_v19 = vadd.f32 %v2904_v47, %v2834_v31 }
 0x3dc   : > { %v3484_v38 = vpop.f32.mrf.mxu1 }
 0x3dd   : > { %v2908_v49 = vmax.f32 %v2905_v19, 0.0 }
 0x3df   : > { %3488 = vmatmul.mubr.msk.f32.vlgmr.msra.gmra.mxu1 %vm2911_vm12, %v2908_v49 }
 0x49f   : > { %v2985_v44 = vpop.f32.mrf.mxu1 }
 0x4a0   : > { %v2986_v61 = vadd.f32 %v2985_v44, %v2910_v60 }
 0x4a1   : > { %v3489_v55 = vpop.f32.mrf.mxu1 }
 0x4a2   : > { %v3283_v43 = vmul.f32 -1.442695, %v2986_v61 }
 0x4a4   : > { %3506 = vpow2.f32 %v3283_v43 }
 0x4b1   : > { %v3507_v45 = vpop.eup %3506 }
 0x4b2   : > { %v2992_v30 = vadd.f32 1.0, %v3507_v45 }
 0x4b4   : > { %3508 = vrcp.f32 %v2992_v30 }
 0x4c1   : > { %v3509_v41 = vpop.eup %3508 }
 0x4c2   : > { %v2998_v21 = vrot.slane %v3509_v41, %v3736_v3 }
 0x4c4   : > { %v2999_v25 = vmul.f32 %v2998_v21, %v2747_v18  ;;  %v3000_v1 = vmul.f32 %v2998_v21, %v2748_v9  ;;  %v3001_v16 = vmul.f32 %v2998_v21, %v2749_v20  ;;  %v3002_v22 = vmul.f32 %v2998_v21, %v2750_v51 }
 0x4c5   : > { %v3003_v56 = vmul.f32 %v2998_v21, %v2751_v7  ;;  %v3004_v34 = vmul.f32 %v2998_v21, %v2752_v57  ;;  %v3005_v3 = vmul.f32 %v2998_v21, %v2753_v12  ;;  %v3006_v17 = vmul.f32 %v2998_v21, %v2754_v0 }
 0x4c6   : > { %v3007_v59 = vadd.f32 %v3511_v10, %v2999_v25  ;;  %v3008_v35 = vadd.f32 %v3512_v32, %v3000_v1  ;;  %v3009_v8 = vadd.f32 %v3513_v63, %v3001_v16  ;;  %v3010_v13 = vadd.f32 %v3514_v54, %v3002_v22 }
 0x4c7   : > { %v3011_v11 = vadd.f32 %v3515_v50, %v3003_v56  ;;  %v3012_v46 = vadd.f32 %v3516_v26, %v3004_v34  ;;  %v3013_v23 = vadd.f32 %v3517_v5, %v3005_v3  ;;  %v3014_v37 = vadd.f32 %v3518_v39, %v3006_v17 }
 0x4c8   : > { %3015 = vst.msk [vmem:[%s406_s22] sm:$0xff] %vm2098_vm1, %v3007_v59  ;;  %3016 = vst.msk [vmem:[%s406_s22 + $0x8] sm:$0xff] %vm2098_vm1, %v3008_v35 }
 0x4c9   : > { %3017 = vst.msk [vmem:[%s406_s22 + $0x10] sm:$0xff] %vm2098_vm1, %v3009_v8  ;;  %3018 = vst.msk [vmem:[%s406_s22 + $0x18] sm:$0xff] %vm2098_vm1, %v3010_v13 }
 0x4ca   : > { %3019 = vst.msk [vmem:[%s406_s22 + $0x20] sm:$0xff] %vm2098_vm1, %v3011_v11  ;;  %3020 = vst.msk [vmem:[%s406_s22 + $0x28] sm:$0xff] %vm2098_vm1, %v3012_v46 }
 0x4cb   : > { %3021 = vst.msk [vmem:[%s406_s22 + $0x30] sm:$0xff] %vm2098_vm1, %v3013_v23  ;;  %3022 = vst.msk [vmem:[%s406_s22 + $0x38] sm:$0xff] %vm2098_vm1, %v3014_v37 }
 0x4cc PF: > { %s21_s17 = sadd.s32 1, %s3525_s17  }
 0x4cd   : > { %p18_p4 = scmp.ge.s32.totalorder %s21_s17, 4  }
 0x4cf   :  { %20 = sbr.rel (!%p18_p4) target bundleno = 1 (0x1), region = 97 }

</bundles_post_ra>
